<compile_context>
chip_gen: v7x
topology: tpu7x:2x2x1
jax: 0.10.0
libtpu: 0.0.40
codegen_flags: <defaults>
</compile_context>

<pallas_src>
import math

import jax
import jax.numpy as jnp
from jax.experimental import pallas as pl
from jax.experimental.pallas import tpu as pltpu

# --- sizes implied by the module ------------------------------------------
standardWidth = 16
standardHeight = 16
inDimension = standardWidth * standardHeight                      # 256
encodedOutputHeight = 15
encodedOutputWidth = 15
middleHiddenLayerSize = encodedOutputWidth * encodedOutputHeight  # 225

encoderDimensions = [inDimension, middleHiddenLayerSize]
decoderDimensions = list(reversed(encoderDimensions))

_LANE = 128
_M_TILE = 256   # batch-tile granularity: MXU-friendly, bf16 sublane-packs cleanly


def _round_up(n, m):
    return ((n + m - 1) // m) * m


def _cdiv(a, b):
    return (a + b - 1) // b


def _pad_axis(a, axis, target):
    pad = target - a.shape[axis]
    if pad == 0:
        return a
    widths = [(0, 0)] * a.ndim
    widths[axis] = (0, pad)
    return jnp.pad(a, widths)


# --- Pallas kernel: fused  sigmoid(sigmoid(x@W1+b1)@W2+b2) ------------------
def autoencoder_kernel(x_ref, w1_ref, b1_ref, w2_ref, b2_ref, o_ref):
    # Cast activations to bf16 in-kernel (no separate XLA cast pass); weights
    # are already bf16.  Accumulate + bias/sigmoid in f32 (v5e-safe VPU/EUP).
    x = x_ref[...].astype(jnp.bfloat16)
    h = jnp.dot(x, w1_ref[...], preferred_element_type=jnp.float32)
    h = jax.nn.sigmoid(h + b1_ref[...])          # (1, Hp) bias broadcasts over rows

    y = jnp.dot(h.astype(jnp.bfloat16), w2_ref[...],
                preferred_element_type=jnp.float32)
    o_ref[...] = jax.nn.sigmoid(y + b2_ref[...]).astype(o_ref.dtype)


# --- one-time parameter prep: zero-pad hidden dim to a lane multiple --------
def prepare_params(w1, b1, w2, b2):
    d_in, h = w1.shape
    assert w2.shape == (h, d_in)
    d_pad = _round_up(d_in, _LANE)   # 256 -> 256 (already aligned)
    h_pad = _round_up(h, _LANE)      # 225 -> 256

    # Zero padding keeps the math identical: padded hidden columns become
    # sigmoid(0)=0.5, but the matching zero rows of w2 cancel them in dot 2.
    w1p = _pad_axis(_pad_axis(w1, 0, d_pad), 1, h_pad).astype(jnp.bfloat16)
    w2p = _pad_axis(_pad_axis(w2, 0, h_pad), 1, d_pad).astype(jnp.bfloat16)
    b1p = _pad_axis(b1.reshape(1, h), 1, h_pad).astype(jnp.float32)
    b2p = _pad_axis(b2.reshape(1, d_in), 1, d_pad).astype(jnp.float32)
    return (w1p, b1p, w2p, b2p, d_in, d_pad, h_pad)


def autoencoder_forward(x, params, *, block_b=2048, out_dtype=jnp.bfloat16):
    w1p, b1p, w2p, b2p, d_in, d_pad, h_pad = params
    B = x.shape[0]
    assert x.shape[1] == d_in
    assert d_pad == d_in   # 256 is already lane-aligned; x never needs feature padding

    # --- batch tiling -------------------------------------------------------
    block_b = max(_M_TILE, _round_up(block_b, _M_TILE))
    b_pad = _round_up(max(B, _M_TILE), _M_TILE)      # batch padded to a 256-multiple
    n_steps = _cdiv(b_pad, block_b)
    # Guarantee >=2 grid steps whenever there is enough work so the "parallel"
    # batch axis actually feeds both v7x TensorCores.
    if n_steps < 2 and b_pad >= 2 * _M_TILE:
        n_steps = 2
    tb = _round_up(_cdiv(b_pad, n_steps), _M_TILE)   # tile: multiple of 256
    b_pad = _round_up(b_pad, tb)
    n_steps = b_pad // tb

    # Pad batch only when needed (no dtype cast here — done in-kernel).
    xp = x if B == b_pad else jnp.pad(x, ((0, b_pad - B), (0, 0)))

    out = pl.pallas_call(
        autoencoder_kernel,
        out_shape=jax.ShapeDtypeStruct((b_pad, d_pad), out_dtype),
        grid=(n_steps,),
        in_specs=[
            pl.BlockSpec((tb, d_pad), lambda i: (i, 0)),       # x tile (streams)
            pl.BlockSpec((d_pad, h_pad), lambda i: (0, 0)),    # w1 (resident)
            pl.BlockSpec((1, h_pad), lambda i: (0, 0)),        # b1 (resident)
            pl.BlockSpec((h_pad, d_pad), lambda i: (0, 0)),    # w2 (resident)
            pl.BlockSpec((1, d_pad), lambda i: (0, 0)),        # b2 (resident)
        ],
        out_specs=pl.BlockSpec((tb, d_pad), lambda i: (i, 0)),
        compiler_params=pltpu.CompilerParams(
            dimension_semantics=("parallel",),                 # megacore on v7x
        ),
    )(xp, w1p, b1p, w2p, b2p)
    return out[:B, :d_in]


# --- deterministic parameter init (PyTorch nn.Linear default scheme) --------
def init_linear(key, fan_in, fan_out):
    """U(-1/sqrt(fan_in), 1/sqrt(fan_in)) for weight (stored (in,out)) and bias."""
    kw, kb = jax.random.split(key)
    bound = 1.0 / math.sqrt(fan_in)
    w = jax.random.uniform(kw, (fan_in, fan_out), jnp.float32, -bound, bound)
    b = jax.random.uniform(kb, (fan_out,), jnp.float32, -bound, bound)
    return w, b


def reference_forward_f32(x, w1, b1, w2, b2):
    h = jax.nn.sigmoid(x @ w1 + b1)
    return jax.nn.sigmoid(h @ w2 + b2)


def reference_forward_bf16(x, w1, b1, w2, b2):
    """Mirrors the kernel's precision (bf16 MXU operands, f32 accumulate).
    Final result kept in f32; kernel additionally rounds its store to bf16."""
    xb = x.astype(jnp.bfloat16)
    w1b = w1.astype(jnp.bfloat16)
    w2b = w2.astype(jnp.bfloat16)
    h = jax.nn.sigmoid(jnp.dot(xb, w1b, preferred_element_type=jnp.float32) + b1)
    y = jnp.dot(h.astype(jnp.bfloat16), w2b, preferred_element_type=jnp.float32) + b2
    return jax.nn.sigmoid(y)


if __name__ == "__main__":
    key = jax.random.PRNGKey(0)
    k_x, k_enc, k_dec = jax.random.split(key, 3)

    batch = 2
    x = jax.random.uniform(k_x, (batch, inDimension), jnp.float32)

    w1, b1 = init_linear(k_enc, encoderDimensions[0], encoderDimensions[1])
    w2, b2 = init_linear(k_dec, decoderDimensions[0], decoderDimensions[1])

    params = prepare_params(w1, b1, w2, b2)

    out = autoencoder_forward(x, params)            # bf16 output by default
    out = jax.block_until_ready(out)
    assert out.shape == (batch, inDimension)
    assert out.dtype == jnp.bfloat16

    out_f32 = out.astype(jnp.float32)

    # Check against a precision-matched (bf16 operands, f32 accumulate)
    # reference — the only extra error is the final bf16 output rounding —
    # and a loose full-f32 sanity bound.
    ref_bf16 = reference_forward_bf16(x, w1, b1, w2, b2)
    ref_f32 = reference_forward_f32(x, w1, b1, w2, b2)
    assert jnp.allclose(out_f32, ref_bf16, atol=1e-2, rtol=0)
    assert jnp.allclose(out_f32, ref_f32, atol=3e-2, rtol=0)

    print("KERNEL_OK")
</pallas_src>

<mosaic_0001>
module attributes {stable_mosaic.version = 11 : i64} {
  func.func @autoencoder_kernel(%arg0: i32, %arg1: memref<256x256xf32, #tpu.memory_space<vmem>>, %arg2: memref<256x256xbf16, #tpu.memory_space<vmem>>, %arg3: memref<1x256xf32, #tpu.memory_space<vmem>>, %arg4: memref<256x256xbf16, #tpu.memory_space<vmem>>, %arg5: memref<1x256xf32, #tpu.memory_space<vmem>>, %arg6: memref<256x256xbf16, #tpu.memory_space<vmem>>) attributes {dimension_semantics = [#tpu.dimension_semantics<parallel>], iteration_bounds = array<i64: 1>, scalar_prefetch = 0 : i64, scratch_operands = 0 : i64, tpu.core_type = #tpu.core_type<tc>, window_params = [{transform_indices = @transform_0, window_bounds = array<i64: 256, 256>}, {pipeline_mode = #tpu.pipeline_mode<synchronous>, transform_indices = @transform_1, window_bounds = array<i64: 256, 256>}, {pipeline_mode = #tpu.pipeline_mode<synchronous>, transform_indices = @transform_2, window_bounds = array<i64: 1, 256>}, {pipeline_mode = #tpu.pipeline_mode<synchronous>, transform_indices = @transform_3, window_bounds = array<i64: 256, 256>}, {pipeline_mode = #tpu.pipeline_mode<synchronous>, transform_indices = @transform_4, window_bounds = array<i64: 1, 256>}, {transform_indices = @transform_5, window_bounds = array<i64: 256, 256>}]} {
    %c0 = arith.constant 0 : index
    %c0_0 = arith.constant 0 : index
    %0 = vector.load %arg1[%c0, %c0_0] : memref<256x256xf32, #tpu.memory_space<vmem>>, vector<256x256xf32>
    %1 = arith.truncf %0 : vector<256x256xf32> to vector<256x256xbf16>
    %c0_1 = arith.constant 0 : index
    %c0_2 = arith.constant 0 : index
    %2 = vector.load %arg2[%c0_1, %c0_2] : memref<256x256xbf16, #tpu.memory_space<vmem>>, vector<256x256xbf16>
    %cst = arith.constant dense<0.000000e+00> : vector<256x256xf32>
    %3 = tpu.matmul %1, %2, %cst {dimension_numbers = #tpu.dot_dimension_numbers<[1], [0], [0], [1], [0, 0, 1, 1], [], []>} : vector<256x256xbf16>, vector<256x256xbf16>, vector<256x256xf32> -> vector<256x256xf32>
    %c0_3 = arith.constant 0 : index
    %c0_4 = arith.constant 0 : index
    %4 = vector.load %arg3[%c0_3, %c0_4] : memref<1x256xf32, #tpu.memory_space<vmem>>, vector<1x256xf32>
    %5 = vector.broadcast %4 : vector<1x256xf32> to vector<256x256xf32>
    %6 = arith.addf %3, %5 : vector<256x256xf32>
    %7 = arith.negf %6 : vector<256x256xf32>
    %8 = math.exp %7 : vector<256x256xf32>
    %cst_5 = arith.constant 1.000000e+00 : f32
    %9 = vector.broadcast %cst_5 : f32 to vector<256x256xf32>
    %10 = arith.addf %9, %8 : vector<256x256xf32>
    %11 = arith.divf %9, %10 : vector<256x256xf32>
    %12 = arith.truncf %11 : vector<256x256xf32> to vector<256x256xbf16>
    %c0_6 = arith.constant 0 : index
    %c0_7 = arith.constant 0 : index
    %13 = vector.load %arg4[%c0_6, %c0_7] : memref<256x256xbf16, #tpu.memory_space<vmem>>, vector<256x256xbf16>
    %cst_8 = arith.constant dense<0.000000e+00> : vector<256x256xf32>
    %14 = tpu.matmul %12, %13, %cst_8 {dimension_numbers = #tpu.dot_dimension_numbers<[1], [0], [0], [1], [0, 0, 1, 1], [], []>} : vector<256x256xbf16>, vector<256x256xbf16>, vector<256x256xf32> -> vector<256x256xf32>
    %c0_9 = arith.constant 0 : index
    %c0_10 = arith.constant 0 : index
    %15 = vector.load %arg5[%c0_9, %c0_10] : memref<1x256xf32, #tpu.memory_space<vmem>>, vector<1x256xf32>
    %16 = vector.broadcast %15 : vector<1x256xf32> to vector<256x256xf32>
    %17 = arith.addf %14, %16 : vector<256x256xf32>
    %18 = arith.negf %17 : vector<256x256xf32>
    %19 = math.exp %18 : vector<256x256xf32>
    %cst_11 = arith.constant 1.000000e+00 : f32
    %20 = vector.broadcast %cst_11 : f32 to vector<256x256xf32>
    %21 = arith.addf %20, %19 : vector<256x256xf32>
    %22 = arith.divf %20, %21 : vector<256x256xf32>
    %23 = arith.truncf %22 : vector<256x256xf32> to vector<256x256xbf16>
    %c0_12 = arith.constant 0 : index
    %c0_13 = arith.constant 0 : index
    %24 = vector.load %arg6[%c0_12, %c0_13] : memref<256x256xbf16, #tpu.memory_space<vmem>>, vector<256x256xbf16>
    tpu.vector_store %arg6[%c0_12, %c0_13], %23 {strides = array<i32>} : memref<256x256xbf16, #tpu.memory_space<vmem>>, vector<256x256xbf16>,
    return
  }
  func.func @transform_0(%arg0: i32) -> (i32, i32) {
    %c0_i32 = arith.constant 0 : i32
    %c0_i32_0 = arith.constant 0 : i32
    return %arg0, %c0_i32 : i32, i32
  }
  func.func @transform_1(%arg0: i32) -> (i32, i32) {
    %c0_i32 = arith.constant 0 : i32
    %c0_i32_0 = arith.constant 0 : i32
    %c0_i32_1 = arith.constant 0 : i32
    return %c0_i32, %c0_i32_0 : i32, i32
  }
  func.func @transform_2(%arg0: i32) -> (i32, i32) {
    %c0_i32 = arith.constant 0 : i32
    %c0_i32_0 = arith.constant 0 : i32
    %c0_i32_1 = arith.constant 0 : i32
    return %c0_i32, %c0_i32_0 : i32, i32
  }
  func.func @transform_3(%arg0: i32) -> (i32, i32) {
    %c0_i32 = arith.constant 0 : i32
    %c0_i32_0 = arith.constant 0 : i32
    %c0_i32_1 = arith.constant 0 : i32
    return %c0_i32, %c0_i32_0 : i32, i32
  }
  func.func @transform_4(%arg0: i32) -> (i32, i32) {
    %c0_i32 = arith.constant 0 : i32
    %c0_i32_0 = arith.constant 0 : i32
    %c0_i32_1 = arith.constant 0 : i32
    return %c0_i32, %c0_i32_0 : i32, i32
  }
  func.func @transform_5(%arg0: i32) -> (i32, i32) {
    %c0_i32 = arith.constant 0 : i32
    %c0_i32_0 = arith.constant 0 : i32
    return %arg0, %c0_i32 : i32, i32
  }
}

</mosaic_0001>

<bundles_post_ra>
// kernel: tpu_custom_call.1
= control target key start
LH: loop header
LB: loop body
LE: loop exit
PB: predicated region body
PF: predicated region fallthrough
CT: control target
= control target key end

     0   :  { %10 = vsyncpa [#allocation3], 0  ;;  %s3209_s0 = inlined_call_operand.hbm [shape: f32[256,256], index: 0, kind: input, shape index: {}]   ;;  %s3210_s1 = inlined_call_operand.hbm [shape: bf16[256,256], index: 1, kind: input, shape index: {}]   ;;  %s3211_s2 = inlined_call_operand.vmem [shape: f32[1,256], index: 2, kind: input, shape index: {}]   ;;  %s3212_s3 = inlined_call_operand.hbm [shape: bf16[256,256], index: 3, kind: input, shape index: {}]   ;;  %s3213_s4 = inlined_call_operand.vmem [shape: f32[1,256], index: 4, kind: input, shape index: {}]   ;;  %s3214_s5 = inlined_call_operand.hbm [shape: bf16[256,256], index: 5, kind: output, shape index: {}]  }
   0x1   :  { %11 = vsyncpa [#allocation6], 0 }
   0x2   :  { %12 = vsyncpa [#allocation4], 0  ;;  %s2960_s18 = smov [#allocation5]   ;;  %s2866_s22 = scalar_lea.hbm %s3210_s1, 4096 }
   0x3   :  { %s30_s19 = sshll.u32 %s2960_s18, 4  ;;  %p2867_p0 = scmp.ne.s32.totalorder %s3210_s1, %s2866_s22  ;;  %s31_s19 = int_to_ptr.vmem [resolvable:$true] %s30_s19 }
   0x4   :  { %p2870_p1 = scmp.lt.u32.totalorder %s2866_s22, %s3210_s1 }
   0x6   :  { %p2872_p2 = pnand %p2870_p1, %p2867_p0 }
   0x8   :  { %2875 = shalt.err (!%p2872_p2)
}
   0x9   :  { %s2876_s27 = scalar_lea.vmem %s31_s19, 4096  ;;  %p2881_p4 = scmp.lt.s32.totalorder %s31_s19, %s31_s19 }
   0xa   :  { %p2877_p3 = scmp.ne.s32.totalorder %s31_s19, %s2876_s27  ;;  %p2882_p5 = scmp.lt.s32.totalorder %s2876_s27, %s2876_s27 }
   0xc   :  { %p2883_p6 = por %p2882_p5, %p2881_p4 }
   0xe   :  { %p2884_p7 = pnand %p2883_p6, %p2877_p3 }
  0x10   :  { %2887 = shalt.err (!%p2884_p7)
}
  0x11   :  { %s2961_s28 = smov 128   ;;  %s2962_s29 = smov 8  }
  0x12   :  { %36 = dma.hbm_to_vmem [thread:$0]  %s3210_s1, 4096, %s31_s19, [#allocation6], %s2961_s28, %s2961_s28, %s2962_s29  }
  0x13   :  { %s2963_s7 = smov [#allocation2]   ;;  %s2888_s11 = scalar_lea.hbm %s3209_s0, 8192 }
  0x14   :  { %s18_s8 = sshll.u32 %s2963_s7, 4  ;;  %p2889_p8 = scmp.ne.s32.totalorder %s3209_s0, %s2888_s11  ;;  %s19_s8 = int_to_ptr.vmem [resolvable:$true] %s18_s8 }
  0x15   :  { %p2892_p9 = scmp.lt.u32.totalorder %s2888_s11, %s3209_s0 }
  0x17   :  { %p2894_p10 = pnand %p2892_p9, %p2889_p8 }
  0x19   :  { %2897 = shalt.err (!%p2894_p10)
}
  0x1a   :  { %s2898_s16 = scalar_lea.vmem %s19_s8, 8192  ;;  %p2903_p12 = scmp.lt.s32.totalorder %s19_s8, %s19_s8 }
  0x1b   :  { %p2899_p11 = scmp.ne.s32.totalorder %s19_s8, %s2898_s16  ;;  %p2904_p13 = scmp.lt.s32.totalorder %s2898_s16, %s2898_s16 }
  0x1d   :  { %p2905_p0 = por %p2904_p13, %p2903_p12 }
  0x1f   :  { %p2906_p1 = pnand %p2905_p0, %p2899_p11 }
  0x21   :  { %2909 = shalt.err (!%p2906_p1)
}
  0x22   :  { %s2964_s1 = smov 256   ;;  %s2965_s17 = smov 16  }
  0x23   :  { %24 = dma.hbm_to_vmem [thread:$0]  %s3209_s0, 8192, %s19_s8, [#allocation3], %s2964_s1, %s2964_s1, %s2965_s17  }
  0x24   :  { %s2966_s20 = smov [#allocation7]   ;;  %s2910_s24 = scalar_lea.hbm %s3212_s3, 4096 }
  0x25   :  { %s44_s21 = sshll.u32 %s2966_s20, 4  ;;  %p2911_p2 = scmp.ne.s32.totalorder %s3212_s3, %s2910_s24  ;;  %s45_s21 = int_to_ptr.vmem [resolvable:$true] %s44_s21 }
  0x26   :  { %p2914_p3 = scmp.lt.u32.totalorder %s2910_s24, %s3212_s3 }
  0x28   :  { %p2916_p4 = pnand %p2914_p3, %p2911_p2 }
  0x2a   :  { %2919 = shalt.err (!%p2916_p4)
}
  0x2b   :  { %s2920_s6 = scalar_lea.vmem %s45_s21, 4096  ;;  %p2925_p6 = scmp.lt.s32.totalorder %s45_s21, %s45_s21 }
  0x2c   :  { %p2921_p5 = scmp.ne.s32.totalorder %s45_s21, %s2920_s6  ;;  %p2926_p7 = scmp.lt.s32.totalorder %s2920_s6, %s2920_s6 }
  0x2e   :  { %p2927_p8 = por %p2926_p7, %p2925_p6 }
  0x30   :  { %p2928_p9 = pnand %p2927_p8, %p2921_p5 }
  0x32   :  { %2931 = shalt.err (!%p2928_p9)
}
  0x33   :  { %50 = dma.hbm_to_vmem [thread:$0]  %s3212_s3, 4096, %s45_s21, [#allocation6], %s2961_s28, %s2961_s28, %s2962_s29  }
  0x34   :  { %2954 = dma.done.wait [#allocation3], 8192  }
  0x35   :  { %2955 = vsyncadd [#allocation3], 4294959104 }
  0x36   :  { %2956 = dma.done.wait [#allocation6], 8192  }
  0x37   :  { %2957 = vsyncadd [#allocation6], 4294959104  ;;  %v2258_v0 = vld [vmem:[#allocation5 + $0x4] ss:$8 sps:$4 sm:$0xff]   ;;  %v2260_v1 = vld [vmem:[#allocation5] ss:$8 sps:$4 sm:$0xff]  }
  0x38   :  { %362 = vmatprep.subr.bf16.mxu0 %v2258_v0  ;;  %v2261_v2 = vld [vmem:[#allocation5 + $0x14] ss:$8 sps:$4 sm:$0xff]   ;;  %v2263_v3 = vld [vmem:[#allocation5 + $0x10] ss:$8 sps:$4 sm:$0xff]   ;;  %v2264_v4 = vld [vmem:[#allocation5 + $0x24] ss:$8 sps:$4 sm:$0xff]  }
  0x39   :  { %363 = vmatpush1.bf16.msra.mxu0 %v2260_v1  ;;  %v2266_v5 = vld [vmem:[#allocation5 + $0x20] ss:$8 sps:$4 sm:$0xff]   ;;  %v2267_v6 = vld [vmem:[#allocation5 + $0x34] ss:$8 sps:$4 sm:$0xff]   ;;  %v2269_v7 = vld [vmem:[#allocation5 + $0x30] ss:$8 sps:$4 sm:$0xff]  }
  0x3a   :  { %364 = vmatprep.subr.bf16.mxu0 %v2261_v2  ;;  %v2270_v8 = vld [vmem:[#allocation5 + $0x44] ss:$8 sps:$4 sm:$0xff]   ;;  %v2272_v9 = vld [vmem:[#allocation5 + $0x40] ss:$8 sps:$4 sm:$0xff]   ;;  %v2273_v10 = vld [vmem:[#allocation5 + $0x54] ss:$8 sps:$4 sm:$0xff]  }
  0x3b   :  { %v2275_v11 = vld [vmem:[#allocation5 + $0x50] ss:$8 sps:$4 sm:$0xff]   ;;  %v2276_v12 = vld [vmem:[#allocation5 + $0x64] ss:$8 sps:$4 sm:$0xff]   ;;  %v2278_v16 = vld [vmem:[#allocation5 + $0x60] ss:$8 sps:$4 sm:$0xff]  }
  0x3c   :  { %v63_v13 = vld [vmem:[#allocation2 + $0x8] sm:$0xff]  ;;  %v65_v14 = vld [vmem:[#allocation2 + $0x18] sm:$0xff]  ;;  %v62_v38 = vld [vmem:[#allocation2] sm:$0xff] }
  0x3d   :  { %365 = vmatpush1.bf16.msra.mxu0 %v2263_v3  ;;  %v127_v15 = vpack.c.bf16 %v65_v14, %v63_v13  ;;  %v2279_v17 = vld [vmem:[#allocation5 + $0x74] ss:$8 sps:$4 sm:$0xff]   ;;  %v2281_v18 = vld [vmem:[#allocation5 + $0x70] ss:$8 sps:$4 sm:$0xff]   ;;  %v2282_v19 = vld [vmem:[#allocation5 + $0x84] ss:$8 sps:$4 sm:$0xff]  }
  0x3e   :  { %366 = vmatprep.subr.bf16.mxu0 %v2264_v4  ;;  %v2284_v20 = vld [vmem:[#allocation5 + $0x80] ss:$8 sps:$4 sm:$0xff]   ;;  %v2285_v21 = vld [vmem:[#allocation5 + $0x94] ss:$8 sps:$4 sm:$0xff]   ;;  %v2287_v22 = vld [vmem:[#allocation5 + $0x90] ss:$8 sps:$4 sm:$0xff]  }
  0x3f   :  { %394 = vmatprep.mubr.bf16.mxu0 %v127_v15  ;;  %v2288_v23 = vld [vmem:[#allocation5 + $0xa4] ss:$8 sps:$4 sm:$0xff]   ;;  %v2290_v24 = vld [vmem:[#allocation5 + $0xa0] ss:$8 sps:$4 sm:$0xff]   ;;  %v2291_v25 = vld [vmem:[#allocation5 + $0xb4] ss:$8 sps:$4 sm:$0xff]  }
  0x40   :  { %v2293_v26 = vld [vmem:[#allocation5 + $0xb0] ss:$8 sps:$4 sm:$0xff]   ;;  %v2294_v27 = vld [vmem:[#allocation5 + $0xc4] ss:$8 sps:$4 sm:$0xff]   ;;  %v2296_v28 = vld [vmem:[#allocation5 + $0xc0] ss:$8 sps:$4 sm:$0xff]  }
  0x41   :  { %367 = vmatpush1.bf16.msra.mxu0 %v2266_v5  ;;  %v2297_v29 = vld [vmem:[#allocation5 + $0xd4] ss:$8 sps:$4 sm:$0xff]   ;;  %v2299_v30 = vld [vmem:[#allocation5 + $0xd0] ss:$8 sps:$4 sm:$0xff]   ;;  %v2300_v31 = vld [vmem:[#allocation5 + $0xe4] ss:$8 sps:$4 sm:$0xff]  }
  0x42   :  { %368 = vmatprep.subr.bf16.mxu0 %v2267_v6  ;;  %v2302_v32 = vld [vmem:[#allocation5 + $0xe0] ss:$8 sps:$4 sm:$0xff]   ;;  %v2303_v33 = vld [vmem:[#allocation5 + $0xf4] ss:$8 sps:$4 sm:$0xff]   ;;  %v2306_v34 = vld [vmem:[#allocation7 + $0x4] ss:$8 sps:$4 sm:$0xff]  }
  0x43   :  { %v2308_v35 = vld [vmem:[#allocation7] ss:$8 sps:$4 sm:$0xff]   ;;  %v2309_v36 = vld [vmem:[#allocation7 + $0x14] ss:$8 sps:$4 sm:$0xff]   ;;  %v2305_v37 = vld [vmem:[#allocation5 + $0xf0] ss:$8 sps:$4 sm:$0xff]   ;;  %1175 = vmatprep.subr.bf16.mxu1 %v2306_v34 }
  0x44   :  { %v64_v39 = vld [vmem:[#allocation2 + $0x10] sm:$0xff]  ;;  %v67_v40 = vld [vmem:[#allocation2 + $0x28] sm:$0xff]  ;;  %v69_v41 = vld [vmem:[#allocation2 + $0x38] sm:$0xff]  ;;  %1176 = vmatpush1.bf16.msra.mxu1 %v2308_v35 }
  0x45   :  { %369 = vmatpush1.bf16.msra.mxu0 %v2269_v7  ;;  %v2311_v42 = vld [vmem:[#allocation7 + $0x10] ss:$8 sps:$4 sm:$0xff]   ;;  %v126_v43 = vpack.c.bf16 %v64_v39, %v62_v38  ;;  %1177 = vmatprep.subr.bf16.mxu1 %v2309_v36  ;;  %v2312_v44 = vld [vmem:[#allocation7 + $0x24] ss:$8 sps:$4 sm:$0xff]   ;;  %v129_v45 = vpack.c.bf16 %v69_v41, %v67_v40  ;;  %v2314_v46 = vld [vmem:[#allocation7 + $0x20] ss:$8 sps:$4 sm:$0xff]  }
  0x46   :  { %370 = vmatprep.subr.bf16.mxu0 %v2270_v8  ;;  %v2315_v47 = vld [vmem:[#allocation7 + $0x34] ss:$8 sps:$4 sm:$0xff]   ;;  %v66_v48 = vld [vmem:[#allocation2 + $0x20] sm:$0xff]  ;;  %v71_v50 = vld [vmem:[#allocation2 + $0x48] sm:$0xff] }
  0x47   :  { %v68_v49 = vld [vmem:[#allocation2 + $0x30] sm:$0xff]  ;;  %v73_v51 = vld [vmem:[#allocation2 + $0x58] sm:$0xff]  ;;  %v2318_v54 = vld [vmem:[#allocation7 + $0x44] ss:$8 sps:$4 sm:$0xff]  }
  0x48   :  { %1178 = vmatpush1.bf16.msra.mxu1 %v2311_v42  ;;  %v2317_v52 = vld [vmem:[#allocation7 + $0x30] ss:$8 sps:$4 sm:$0xff]   ;;  %v128_v53 = vpack.c.bf16 %v68_v49, %v66_v48  ;;  %v131_v55 = vpack.c.bf16 %v73_v51, %v71_v50  ;;  %v2320_v56 = vld [vmem:[#allocation7 + $0x40] ss:$8 sps:$4 sm:$0xff]   ;;  %v2321_v57 = vld [vmem:[#allocation7 + $0x54] ss:$8 sps:$4 sm:$0xff]  }
  0x49   :  { %371 = vmatpush1.bf16.msra.mxu0 %v2272_v9  ;;  %1179 = vmatprep.subr.bf16.mxu1 %v2312_v44  ;;  %v70_v58 = vld [vmem:[#allocation2 + $0x40] sm:$0xff]  ;;  %v72_v59 = vld [vmem:[#allocation2 + $0x50] sm:$0xff]  ;;  %v75_v60 = vld [vmem:[#allocation2 + $0x68] sm:$0xff] }
  0x4a   :  { %372 = vmatprep.subr.bf16.mxu0 %v2273_v10  ;;  %v77_v61 = vld [vmem:[#allocation2 + $0x78] sm:$0xff]  ;;  %v130_v63 = vpack.c.bf16 %v72_v59, %v70_v58  ;;  %v2324_v0 = vld [vmem:[#allocation7 + $0x64] ss:$8 sps:$4 sm:$0xff]   ;;  %v2326_v2 = vld [vmem:[#allocation7 + $0x60] ss:$8 sps:$4 sm:$0xff]  }
  0x4b   :  { %v2323_v62 = vld [vmem:[#allocation7 + $0x50] ss:$8 sps:$4 sm:$0xff]   ;;  %v133_v1 = vpack.c.bf16 %v77_v61, %v75_v60  ;;  %v2327_v3 = vld [vmem:[#allocation7 + $0x74] ss:$8 sps:$4 sm:$0xff]   ;;  %v74_v4 = vld [vmem:[#allocation2 + $0x60] sm:$0xff] }
  0x4c   :  { %1180 = vmatpush1.bf16.msra.mxu1 %v2314_v46  ;;  %v76_v5 = vld [vmem:[#allocation2 + $0x70] sm:$0xff]  ;;  %v79_v6 = vld [vmem:[#allocation2 + $0x88] sm:$0xff]  ;;  %v81_v7 = vld [vmem:[#allocation2 + $0x98] sm:$0xff] }
  0x4d   :  { %373 = vmatpush1.bf16.msra.mxu0 %v2275_v11  ;;  %1181 = vmatprep.subr.bf16.mxu1 %v2315_v47  ;;  %v132_v8 = vpack.c.bf16 %v76_v5, %v74_v4  ;;  %v135_v9 = vpack.c.bf16 %v81_v7, %v79_v6  ;;  %v78_v10 = vld [vmem:[#allocation2 + $0x80] sm:$0xff]  ;;  %v80_v11 = vld [vmem:[#allocation2 + $0x90] sm:$0xff]  ;;  %v85_v13 = vld [vmem:[#allocation2 + $0xb8] sm:$0xff] }
  0x4e   :  { %374 = vmatprep.subr.bf16.mxu0 %v2276_v12  ;;  %v83_v12 = vld [vmem:[#allocation2 + $0xa8] sm:$0xff]  ;;  %v134_v14 = vpack.c.bf16 %v80_v11, %v78_v10  ;;  %v94_v34 = vld [vmem:[#allocation2 + $0x100] sm:$0xff]  ;;  %v96_v35 = vld [vmem:[#allocation2 + $0x110] sm:$0xff] }
  0x4f   :  { %v137_v15 = vpack.c.bf16 %v85_v13, %v83_v12  ;;  %v99_v36 = vld [vmem:[#allocation2 + $0x128] sm:$0xff]  ;;  %v142_v38 = vpack.c.bf16 %v96_v35, %v94_v34  ;;  %v98_v40 = vld [vmem:[#allocation2 + $0x120] sm:$0xff]  ;;  %v100_v41 = vld [vmem:[#allocation2 + $0x130] sm:$0xff] }
  0x50   :  { %1182 = vmatpush1.bf16.msra.mxu1 %v2317_v52  ;;  %v103_v42 = vld [vmem:[#allocation2 + $0x148] sm:$0xff]  ;;  %v144_v44 = vpack.c.bf16 %v100_v41, %v98_v40  ;;  %v102_v46 = vld [vmem:[#allocation2 + $0x140] sm:$0xff]  ;;  %v104_v47 = vld [vmem:[#allocation2 + $0x150] sm:$0xff] }
  0x51   :  { %375 = vmatpush1.bf16.msra.mxu0 %v2278_v16  ;;  %1183 = vmatprep.subr.bf16.mxu1 %v2318_v54  ;;  %v82_v16 = vld [vmem:[#allocation2 + $0xa0] sm:$0xff]  ;;  %v107_v48 = vld [vmem:[#allocation2 + $0x168] sm:$0xff]  ;;  %v109_v49 = vld [vmem:[#allocation2 + $0x178] sm:$0xff]  ;;  %v146_v50 = vpack.c.bf16 %v104_v47, %v102_v46 }
  0x52   :  { %376 = vmatprep.subr.bf16.mxu0 %v2279_v17  ;;  %v84_v17 = vld [vmem:[#allocation2 + $0xb0] sm:$0xff]  ;;  %v149_v51 = vpack.c.bf16 %v109_v49, %v107_v48  ;;  %v106_v52 = vld [vmem:[#allocation2 + $0x160] sm:$0xff]  ;;  %v119_v10 = vld [vmem:[#allocation2 + $0x1c8] sm:$0xff] }
  0x53   :  { %v2329_v54 = vld [vmem:[#allocation7 + $0x70] ss:$8 sps:$4 sm:$0xff]   ;;  %v2330_v58 = vld [vmem:[#allocation7 + $0x84] ss:$8 sps:$4 sm:$0xff]   ;;  %v2332_v60 = vld [vmem:[#allocation7 + $0x80] ss:$8 sps:$4 sm:$0xff]  }
  0x54   :  { %1184 = vmatpush1.bf16.msra.mxu1 %v2320_v56  ;;  %v113_v56 = vld [vmem:[#allocation2 + $0x198] sm:$0xff]  ;;  %v2336_v4 = vld [vmem:[#allocation7 + $0xa4] ss:$8 sps:$4 sm:$0xff]   ;;  %v2338_v6 = vld [vmem:[#allocation7 + $0xa0] ss:$8 sps:$4 sm:$0xff]  }
  0x55   :  { %377 = vmatpush1.bf16.msra.mxu0 %v2281_v18  ;;  %1185 = vmatprep.subr.bf16.mxu1 %v2321_v57  ;;  %v87_v18 = vld [vmem:[#allocation2 + $0xc8] sm:$0xff]  ;;  %v2333_v61 = vld [vmem:[#allocation7 + $0x94] ss:$8 sps:$4 sm:$0xff]   ;;  %v2341_v12 = vld [vmem:[#allocation7 + $0xb0] ss:$8 sps:$4 sm:$0xff]  }
  0x56   :  { %378 = vmatprep.subr.bf16.mxu0 %v2282_v19  ;;  %v89_v19 = vld [vmem:[#allocation2 + $0xd8] sm:$0xff]  ;;  %v190_v35 = vld [vmem:[%s3211_s2] sm:$0x3] }
  0x57   :  { %v2339_v7 = vld [vmem:[#allocation7 + $0xb4] ss:$8 sps:$4 sm:$0xff]  }
  0x58   :  { %1186 = vmatpush1.bf16.msra.mxu1 %v2323_v62  ;;  %v110_v62 = vld [vmem:[#allocation2 + $0x180] sm:$0xff]  ;;  %v121_v11 = vld [vmem:[#allocation2 + $0x1d8] sm:$0xff] }
  0x59   :  { %379 = vmatpush1.bf16.msra.mxu0 %v2284_v20  ;;  %1187 = vmatprep.subr.bf16.mxu1 %v2324_v0  ;;  %v136_v20 = vpack.c.bf16 %v84_v17, %v82_v16  ;;  %v2335_v0 = vld [vmem:[#allocation7 + $0x90] ss:$8 sps:$4 sm:$0xff]   ;;  %v2344_v16 = vld [vmem:[#allocation7 + $0xc0] ss:$8 sps:$4 sm:$0xff]  }
  0x5a   :  { %380 = vmatprep.subr.bf16.mxu0 %v2285_v21  ;;  %v139_v21 = vpack.c.bf16 %v89_v19, %v87_v18  ;;  %v118_v17 = vld [vmem:[#allocation2 + $0x1c0] sm:$0xff]  ;;  %v120_v18 = vld [vmem:[#allocation2 + $0x1d0] sm:$0xff] }
  0x5b   :  { %v2345_v19 = vld [vmem:[#allocation7 + $0xd4] ss:$8 sps:$4 sm:$0xff]  }
  0x5c   :  { %1188 = vmatpush1.bf16.msra.mxu1 %v2326_v2  ;;  %v117_v2 = vld [vmem:[#allocation2 + $0x1b8] sm:$0xff] }
  0x5d   :  { %381 = vmatpush1.bf16.msra.mxu0 %v2287_v22  ;;  %1189 = vmatprep.subr.bf16.mxu1 %v2327_v3  ;;  %v86_v22 = vld [vmem:[#allocation2 + $0xc0] sm:$0xff] }
  0x5e   :  { %382 = vmatprep.subr.bf16.mxu0 %v2288_v23  ;;  %v88_v23 = vld [vmem:[#allocation2 + $0xd0] sm:$0xff] }
  0x60   :  { %1190 = vmatpush1.bf16.msra.mxu1 %v2329_v54 }
  0x61   :  { %383 = vmatpush1.bf16.msra.mxu0 %v2290_v24  ;;  %v91_v24 = vld [vmem:[#allocation2 + $0xe8] sm:$0xff]  ;;  %1191 = vmatprep.subr.bf16.mxu1 %v2330_v58 }
  0x62   :  { %384 = vmatprep.subr.bf16.mxu0 %v2291_v25  ;;  %v93_v25 = vld [vmem:[#allocation2 + $0xf8] sm:$0xff] }
  0x64   :  { %1192 = vmatpush1.bf16.msra.mxu1 %v2332_v60 }
  0x65   :  { %385 = vmatpush1.bf16.msra.mxu0 %v2293_v26  ;;  %v138_v26 = vpack.c.bf16 %v88_v23, %v86_v22  ;;  %1193 = vmatprep.subr.bf16.mxu1 %v2333_v61  ;;  %v2347_v22 = vld [vmem:[#allocation7 + $0xd0] ss:$8 sps:$4 sm:$0xff]   ;;  %v154_v23 = vpack.c.bf16 %v120_v18, %v118_v17 }
  0x66   :  { %386 = vmatprep.subr.bf16.mxu0 %v2294_v27  ;;  %v141_v27 = vpack.c.bf16 %v93_v25, %v91_v24  ;;  %v2348_v25 = vld [vmem:[#allocation7 + $0xe4] ss:$8 sps:$4 sm:$0xff]  }
  0x68   :  { %1194 = vmatpush1.bf16.msra.mxu1 %v2335_v0 }
  0x69   :  { %387 = vmatpush1.bf16.msra.mxu0 %v2296_v28  ;;  %v90_v28 = vld [vmem:[#allocation2 + $0xe0] sm:$0xff]  ;;  %1195 = vmatprep.subr.bf16.mxu1 %v2336_v4 }
  0x6a   :  { %388 = vmatprep.subr.bf16.mxu0 %v2297_v29  ;;  %v92_v29 = vld [vmem:[#allocation2 + $0xf0] sm:$0xff] }
  0x6c   :  { %1196 = vmatpush1.bf16.msra.mxu1 %v2338_v6 }
  0x6d   :  { %389 = vmatpush1.bf16.msra.mxu0 %v2299_v30  ;;  %v95_v30 = vld [vmem:[#allocation2 + $0x108] sm:$0xff]  ;;  %1197 = vmatprep.subr.bf16.mxu1 %v2339_v7 }
  0x6e   :  { %390 = vmatprep.subr.bf16.mxu0 %v2300_v31  ;;  %v97_v31 = vld [vmem:[#allocation2 + $0x118] sm:$0xff] }
  0x70   :  { %1198 = vmatpush1.bf16.msra.mxu1 %v2341_v12 }
  0x71   :  { %391 = vmatpush1.bf16.msra.mxu0 %v2302_v32  ;;  %v140_v32 = vpack.c.bf16 %v92_v29, %v90_v28  ;;  %v124_v28 = vld [vmem:[#allocation2 + $0x1f0] sm:$0xff] }
  0x72   :  { %392 = vmatprep.subr.bf16.mxu0 %v2303_v33  ;;  %v143_v33 = vpack.c.bf16 %v97_v31, %v95_v30  ;;  %v2351_v29 = vld [vmem:[#allocation7 + $0xf4] ss:$8 sps:$4 sm:$0xff]   ;;  %v2353_v30 = vld [vmem:[#allocation7 + $0xf0] ss:$8 sps:$4 sm:$0xff]  }
  0x75   :  { %393 = vmatpush1.bf16.msra.mxu0 %v2305_v37  ;;  %v101_v37 = vld [vmem:[#allocation2 + $0x138] sm:$0xff] }
  0x76   :  { %v145_v39 = vpack.c.bf16 %v101_v37, %v99_v36 }
  0x78   :  { %395 = vmatmul.mubr.bf16.vlgmr.msra.gmra.mrb[0].mxu0 %v126_v43  ;;  %v105_v43 = vld [vmem:[#allocation2 + $0x158] sm:$0xff] }
  0x79   :  { %404 = vmatprep.mubr.bf16.mxu0 %v129_v45  ;;  %v147_v45 = vpack.c.bf16 %v105_v43, %v103_v42 }
  0x80   :  { %405 = vmatmul.mubr.bf16.gmra.mrb[4].mxu0 %v128_v53  ;;  %v108_v53 = vld [vmem:[#allocation2 + $0x170] sm:$0xff] }
  0x81   :  { %414 = vmatprep.mubr.bf16.mxu0 %v131_v55  ;;  %v111_v55 = vld [vmem:[#allocation2 + $0x188] sm:$0xff]  ;;  %v148_v57 = vpack.c.bf16 %v108_v53, %v106_v52 }
  0x82   :  { %v151_v59 = vpack.c.bf16 %v113_v56, %v111_v55 }
  0x88   :  { %415 = vmatmul.mubr.bf16.gmra.mrb[8].mxu0 %v130_v63  ;;  %v112_v63 = vld [vmem:[#allocation2 + $0x190] sm:$0xff] }
  0x89   :  { %424 = vmatprep.mubr.bf16.mxu0 %v133_v1  ;;  %v115_v1 = vld [vmem:[#allocation2 + $0x1a8] sm:$0xff]  ;;  %v150_v3 = vpack.c.bf16 %v112_v63, %v110_v62 }
  0x8a   :  { %v153_v5 = vpack.c.bf16 %v117_v2, %v115_v1 }
  0x90   :  { %425 = vmatmul.mubr.bf16.gmra.mrb[12].mxu0 %v132_v8  ;;  %v114_v8 = vld [vmem:[#allocation2 + $0x1a0] sm:$0xff] }
  0x91   :  { %434 = vmatprep.mubr.bf16.mxu0 %v135_v9  ;;  %v116_v9 = vld [vmem:[#allocation2 + $0x1b0] sm:$0xff] }
  0x92   :  { %v152_v13 = vpack.c.bf16 %v116_v9, %v114_v8 }
  0x98   :  { %435 = vmatmul.mubr.bf16.gmra.mrb[16].mxu0 %v134_v14  ;;  %v155_v14 = vpack.c.bf16 %v121_v11, %v119_v10 }
  0x99   :  { %444 = vmatprep.mubr.bf16.mxu0 %v137_v15  ;;  %v2342_v15 = vld [vmem:[#allocation7 + $0xc4] ss:$8 sps:$4 sm:$0xff]  }
  0x9a   :  { %1199 = vmatprep.subr.bf16.mxu1 %v2342_v15 }
  0x9b   :  { %1200 = vmatpush1.bf16.msra.mxu1 %v2344_v16 }
  0x9c   :  { %1201 = vmatprep.subr.bf16.mxu1 %v2345_v19 }
  0x9f   :  { %1202 = vmatpush1.bf16.msra.mxu1 %v2347_v22 }
  0xa0   :  { %445 = vmatmul.mubr.bf16.gmra.mrb[20].mxu0 %v136_v20  ;;  %v123_v20 = vld [vmem:[#allocation2 + $0x1e8] sm:$0xff]  ;;  %1203 = vmatprep.subr.bf16.mxu1 %v2348_v25 }
  0xa1   :  { %454 = vmatprep.mubr.bf16.mxu0 %v139_v21  ;;  %v125_v21 = vld [vmem:[#allocation2 + $0x1f8] sm:$0xff] }
  0xa2   :  { %v157_v24 = vpack.c.bf16 %v125_v21, %v123_v20 }
  0xa8   :  { %455 = vmatmul.mubr.bf16.gmra.mrb[24].mxu0 %v138_v26  ;;  %v2350_v26 = vld [vmem:[#allocation7 + $0xe0] ss:$8 sps:$4 sm:$0xff]  }
  0xa9   :  { %464 = vmatprep.mubr.bf16.mxu0 %v141_v27  ;;  %1204 = vmatpush1.bf16.msra.mxu1 %v2350_v26  ;;  %v122_v27 = vld [vmem:[#allocation2 + $0x1e0] sm:$0xff] }
  0xaa   :  { %1205 = vmatprep.subr.bf16.mxu1 %v2351_v29  ;;  %v156_v31 = vpack.c.bf16 %v124_v28, %v122_v27 }
  0xad   :  { %1206 = vmatpush1.bf16.msra.mxu1 %v2353_v30 }
  0xb0   :  { %465 = vmatmul.mubr.bf16.gmra.mrb[28].mxu0 %v140_v32  ;;  %v192_v32 = vlaneseq }
  0xb1   :  { %474 = vmatprep.mubr.bf16.mxu0 %v143_v33 }
  0xb2   :  { %v3040_v33 = vshrl.u32 %v192_v32, 7 }
  0xb4   :  { %v194_v34 = vsub.s32 0, %v3040_v33  ;;  %v198_v36 = vsub.s32 1, %v3040_v33 }
  0xb6   :  { %v3049_v37 = vrot.slane %v190_v35, %v194_v34 }
  0xb8   :  { %475 = vmatmul.mubr.bf16.gmra.mrb[32].mxu0 %v142_v38  ;;  %v3053_v38 = vrot.slane %v190_v35, %v198_v36 }
  0xb9   :  { %484 = vmatprep.mubr.bf16.mxu0 %v145_v39 }
  0xc0   :  { %485 = vmatmul.mubr.bf16.gmra.mrb[36].mxu0 %v144_v44 }
  0xc1   :  { %494 = vmatprep.mubr.bf16.mxu0 %v147_v45 }
  0xc8   :  { %495 = vmatmul.mubr.bf16.gmra.mrb[40].mxu0 %v146_v50 }
  0xc9   :  { %504 = vmatprep.mubr.bf16.mxu0 %v149_v51 }
  0xd0   :  { %505 = vmatmul.mubr.bf16.gmra.mrb[44].mxu0 %v148_v57 }
  0xd1   :  { %514 = vmatprep.mubr.bf16.mxu0 %v151_v59 }
  0xd8   :  { %515 = vmatmul.mubr.bf16.gmra.mrb[48].mxu0 %v150_v3 }
  0xd9   :  { %524 = vmatprep.mubr.bf16.mxu0 %v153_v5 }
  0xe0   :  { %525 = vmatmul.mubr.bf16.gmra.mrb[52].mxu0 %v152_v13 }
  0xe1   :  { %534 = vmatprep.mubr.bf16.mxu0 %v155_v14 }
  0xe8   :  { %535 = vmatmul.mubr.bf16.gmra.mrb[56].mxu0 %v154_v23 }
  0xe9   :  { %544 = vmatprep.mubr.bf16.mxu0 %v157_v24 }
  0xf0   :  { %545 = vmatmul.mubr.bf16.gmra.mrb[60].mxu0 %v156_v31 }
 0x14b   :  { %v396_v39 = vpop.f32.mrb[0].mxu0 }
 0x14c   :  { %v397_v40 = vadd.f32 %v396_v39, %v3049_v37  ;;  %v398_v41 = vpop.f32.mrb[1].mxu0 }
 0x14d   :  { %v399_v42 = vadd.f32 %v398_v41, %v3053_v38  ;;  %v400_v43 = vpop.f32.mrb[2].mxu0 }
 0x14e   :  { %v2026_v44 = vmul.f32 -1.442695, %v397_v40  ;;  %v401_v45 = vadd.f32 %v400_v43, %v3049_v37  ;;  %v402_v46 = vpop.f32.mrb[3].mxu0 }
 0x14f   :  { %v2027_v47 = vmul.f32 -1.442695, %v399_v42  ;;  %v403_v48 = vadd.f32 %v402_v46, %v3053_v38 }
 0x150   :  { %2354 = vpow2.f32 %v2026_v44  ;;  %v2028_v49 = vmul.f32 -1.442695, %v401_v45 }
 0x151   :  { %2356 = vpow2.f32 %v2027_v47  ;;  %v2029_v50 = vmul.f32 -1.442695, %v403_v48 }
 0x152   :  { %2358 = vpow2.f32 %v2028_v49 }
 0x153   :  { %2360 = vpow2.f32 %v2029_v50  ;;  %v406_v51 = vpop.f32.mrb[4].mxu0 }
 0x154   :  { %v407_v52 = vadd.f32 %v406_v51, %v3049_v37  ;;  %v408_v53 = vpop.f32.mrb[5].mxu0 }
 0x155   :  { %v409_v54 = vadd.f32 %v408_v53, %v3053_v38  ;;  %v410_v55 = vpop.f32.mrb[6].mxu0 }
 0x156   :  { %v2030_v56 = vmul.f32 -1.442695, %v407_v52  ;;  %v411_v57 = vadd.f32 %v410_v55, %v3049_v37  ;;  %v412_v58 = vpop.f32.mrb[7].mxu0 }
 0x157   :  { %v2031_v59 = vmul.f32 -1.442695, %v409_v54  ;;  %v413_v60 = vadd.f32 %v412_v58, %v3053_v38 }
 0x158   :  { %2362 = vpow2.f32 %v2030_v56  ;;  %v2032_v61 = vmul.f32 -1.442695, %v411_v57 }
 0x159   :  { %2364 = vpow2.f32 %v2031_v59  ;;  %v2033_v62 = vmul.f32 -1.442695, %v413_v60 }
 0x15a   :  { %v2355_v63 = vpop.eup %2354  ;;  %2366 = vpow2.f32 %v2032_v61 }
 0x15b   :  { %v2357_v0 = vpop.eup %2356  ;;  %v747_v1 = vadd.f32 1.0, %v2355_v63  ;;  %2368 = vpow2.f32 %v2033_v62  ;;  %v416_v2 = vpop.f32.mrb[8].mxu0 }
 0x15c   :  { %v2359_v3 = vpop.eup %2358  ;;  %v748_v4 = vadd.f32 1.0, %v2357_v0  ;;  %v417_v5 = vadd.f32 %v416_v2, %v3049_v37  ;;  %v418_v6 = vpop.f32.mrb[9].mxu0 }
 0x15d   :  { %v2361_v7 = vpop.eup %2360  ;;  %2370 = vrcp.f32 %v747_v1  ;;  %v749_v8 = vadd.f32 1.0, %v2359_v3  ;;  %v419_v9 = vadd.f32 %v418_v6, %v3053_v38  ;;  %v420_v10 = vpop.f32.mrb[10].mxu0 }
 0x15e   :  { %2372 = vrcp.f32 %v748_v4  ;;  %v750_v11 = vadd.f32 1.0, %v2361_v7  ;;  %v2034_v12 = vmul.f32 -1.442695, %v417_v5  ;;  %v421_v13 = vadd.f32 %v420_v10, %v3049_v37  ;;  %v422_v14 = vpop.f32.mrb[11].mxu0 }
 0x15f   :  { %2374 = vrcp.f32 %v749_v8  ;;  %v2035_v15 = vmul.f32 -1.442695, %v419_v9  ;;  %v423_v16 = vadd.f32 %v422_v14, %v3053_v38 }
 0x160   :  { %2376 = vrcp.f32 %v750_v11  ;;  %v2036_v17 = vmul.f32 -1.442695, %v421_v13 }
 0x161   :  { %2378 = vpow2.f32 %v2034_v12  ;;  %v2037_v18 = vmul.f32 -1.442695, %v423_v16 }
 0x162   :  { %v2363_v19 = vpop.eup %2362  ;;  %2380 = vpow2.f32 %v2035_v15 }
 0x163   :  { %v2365_v20 = vpop.eup %2364  ;;  %v751_v21 = vadd.f32 1.0, %v2363_v19  ;;  %2382 = vpow2.f32 %v2036_v17  ;;  %v426_v22 = vpop.f32.mrb[12].mxu0 }
 0x164   :  { %v2367_v23 = vpop.eup %2366  ;;  %v752_v24 = vadd.f32 1.0, %v2365_v20  ;;  %2384 = vpow2.f32 %v2037_v18  ;;  %v427_v25 = vadd.f32 %v426_v22, %v3049_v37  ;;  %v428_v26 = vpop.f32.mrb[13].mxu0 }
 0x165   :  { %v2369_v27 = vpop.eup %2368  ;;  %2386 = vrcp.f32 %v751_v21  ;;  %v753_v28 = vadd.f32 1.0, %v2367_v23  ;;  %v429_v29 = vadd.f32 %v428_v26, %v3053_v38  ;;  %v430_v30 = vpop.f32.mrb[14].mxu0 }
 0x166   :  { %2388 = vrcp.f32 %v752_v24  ;;  %v754_v31 = vadd.f32 1.0, %v2369_v27  ;;  %v2038_v32 = vmul.f32 -1.442695, %v427_v25  ;;  %v431_v35 = vadd.f32 %v430_v30, %v3049_v37  ;;  %v432_v39 = vpop.f32.mrb[15].mxu0 }
 0x167   :  { %v2371_v40 = vpop.eup %2370  ;;  %2390 = vrcp.f32 %v753_v28  ;;  %v2039_v41 = vmul.f32 -1.442695, %v429_v29  ;;  %v433_v42 = vadd.f32 %v432_v39, %v3053_v38 }
 0x168   :  { %v2373_v43 = vpop.eup %2372  ;;  %2392 = vrcp.f32 %v754_v31  ;;  %v2040_v44 = vmul.f32 -1.442695, %v431_v35 }
 0x169   :  { %v2375_v45 = vpop.eup %2374  ;;  %2394 = vpow2.f32 %v2038_v32  ;;  %v2041_v46 = vmul.f32 -1.442695, %v433_v42 }
 0x16a   :  { %v2377_v47 = vpop.eup %2376  ;;  %2396 = vpow2.f32 %v2039_v41  ;;  %v939_v48 = vpack.c.bf16 %v2375_v45, %v2371_v40 }
 0x16b   :  { %v2379_v49 = vpop.eup %2378  ;;  %2398 = vpow2.f32 %v2040_v44  ;;  %v436_v50 = vpop.f32.mrb[16].mxu0  ;;  %v940_v51 = vpack.c.bf16 %v2377_v47, %v2373_v43 }
 0x16c   :  { %v2381_v52 = vpop.eup %2380  ;;  %v755_v53 = vadd.f32 1.0, %v2379_v49  ;;  %2400 = vpow2.f32 %v2041_v46  ;;  %v437_v54 = vadd.f32 %v436_v50, %v3049_v37  ;;  %v438_v55 = vpop.f32.mrb[17].mxu0 }
 0x16d   :  { %v2383_v56 = vpop.eup %2382  ;;  %v756_v57 = vadd.f32 1.0, %v2381_v52  ;;  %v439_v58 = vadd.f32 %v438_v55, %v3053_v38  ;;  %v440_v59 = vpop.f32.mrb[18].mxu0  ;;  %1207 = vmatprep.mubr.bf16.mxu1 %v940_v51 }
 0x16e   :  { %v2385_v60 = vpop.eup %2384  ;;  %2402 = vrcp.f32 %v755_v53  ;;  %v757_v61 = vadd.f32 1.0, %v2383_v56  ;;  %v2042_v62 = vmul.f32 -1.442695, %v437_v54  ;;  %v441_v63 = vadd.f32 %v440_v59, %v3049_v37  ;;  %v442_v0 = vpop.f32.mrb[19].mxu0  ;;  %1208 = vmatmul.mubr.bf16.vlgmr.msra.gmra.mrb[0].mxu1 %v939_v48 }
 0x16f   :  { %v2387_v1 = vpop.eup %2386  ;;  %2404 = vrcp.f32 %v756_v57  ;;  %v758_v2 = vadd.f32 1.0, %v2385_v60  ;;  %v2043_v3 = vmul.f32 -1.442695, %v439_v58  ;;  %v443_v4 = vadd.f32 %v442_v0, %v3053_v38 }
 0x170   :  { %v2389_v5 = vpop.eup %2388  ;;  %2406 = vrcp.f32 %v757_v61  ;;  %v2044_v6 = vmul.f32 -1.442695, %v441_v63 }
 0x171   :  { %v2391_v7 = vpop.eup %2390  ;;  %2408 = vrcp.f32 %v758_v2  ;;  %v2045_v8 = vmul.f32 -1.442695, %v443_v4 }
 0x172   :  { %v2393_v9 = vpop.eup %2392  ;;  %2410 = vpow2.f32 %v2042_v62  ;;  %v941_v10 = vpack.c.bf16 %v2391_v7, %v2387_v1 }
 0x173   :  { %v2395_v11 = vpop.eup %2394  ;;  %2412 = vpow2.f32 %v2043_v3  ;;  %v446_v12 = vpop.f32.mrb[20].mxu0  ;;  %v942_v13 = vpack.c.bf16 %v2393_v9, %v2389_v5 }
 0x174   :  { %v2397_v14 = vpop.eup %2396  ;;  %v759_v15 = vadd.f32 1.0, %v2395_v11  ;;  %2414 = vpow2.f32 %v2044_v6  ;;  %v447_v16 = vadd.f32 %v446_v12, %v3049_v37  ;;  %v448_v17 = vpop.f32.mrb[21].mxu0 }
 0x175   :  { %v2399_v18 = vpop.eup %2398  ;;  %v760_v19 = vadd.f32 1.0, %v2397_v14  ;;  %2416 = vpow2.f32 %v2045_v8  ;;  %v449_v20 = vadd.f32 %v448_v17, %v3053_v38  ;;  %v450_v21 = vpop.f32.mrb[22].mxu0  ;;  %1217 = vmatprep.mubr.bf16.mxu1 %v942_v13 }
 0x176   :  { %v2401_v22 = vpop.eup %2400  ;;  %2418 = vrcp.f32 %v759_v15  ;;  %v761_v23 = vadd.f32 1.0, %v2399_v18  ;;  %v2046_v24 = vmul.f32 -1.442695, %v447_v16  ;;  %v451_v25 = vadd.f32 %v450_v21, %v3049_v37  ;;  %v452_v26 = vpop.f32.mrb[23].mxu0  ;;  %1218 = vmatmul.mubr.bf16.gmra.mrb[4].mxu1 %v941_v10 }
 0x177   :  { %2420 = vrcp.f32 %v760_v19  ;;  %v762_v27 = vadd.f32 1.0, %v2401_v22  ;;  %v2047_v28 = vmul.f32 -1.442695, %v449_v20  ;;  %v453_v29 = vadd.f32 %v452_v26, %v3053_v38 }
 0x178   :  { %v2403_v30 = vpop.eup %2402  ;;  %2422 = vrcp.f32 %v761_v23  ;;  %v2048_v31 = vmul.f32 -1.442695, %v451_v25 }
 0x179   :  { %v2405_v32 = vpop.eup %2404  ;;  %2424 = vrcp.f32 %v762_v27  ;;  %v2049_v35 = vmul.f32 -1.442695, %v453_v29 }
 0x17a   :  { %v2407_v39 = vpop.eup %2406  ;;  %2426 = vpow2.f32 %v2046_v24 }
 0x17b   :  { %v2409_v40 = vpop.eup %2408  ;;  %2428 = vpow2.f32 %v2047_v28  ;;  %v456_v41 = vpop.f32.mrb[24].mxu0  ;;  %v943_v42 = vpack.c.bf16 %v2407_v39, %v2403_v30 }
 0x17c   :  { %v2411_v43 = vpop.eup %2410  ;;  %2430 = vpow2.f32 %v2048_v31  ;;  %v457_v44 = vadd.f32 %v456_v41, %v3049_v37  ;;  %v458_v45 = vpop.f32.mrb[25].mxu0  ;;  %v944_v46 = vpack.c.bf16 %v2409_v40, %v2405_v32 }
 0x17d   :  { %v2413_v47 = vpop.eup %2412  ;;  %v763_v48 = vadd.f32 1.0, %v2411_v43  ;;  %2432 = vpow2.f32 %v2049_v35  ;;  %v459_v49 = vadd.f32 %v458_v45, %v3053_v38  ;;  %v460_v50 = vpop.f32.mrb[26].mxu0 }
 0x17e   :  { %v2415_v51 = vpop.eup %2414  ;;  %v764_v52 = vadd.f32 1.0, %v2413_v47  ;;  %v461_v53 = vadd.f32 %v460_v50, %v3049_v37  ;;  %1227 = vmatprep.mubr.bf16.mxu1 %v944_v46  ;;  %v462_v54 = vpop.f32.mrb[27].mxu0  ;;  %v2050_v57 = vmul.f32 -1.442695, %v457_v44 }
 0x17f   :  { %v2417_v55 = vpop.eup %2416  ;;  %2434 = vrcp.f32 %v763_v48  ;;  %v765_v56 = vadd.f32 1.0, %v2415_v51  ;;  %v463_v58 = vadd.f32 %v462_v54, %v3053_v38  ;;  %1228 = vmatmul.mubr.bf16.gmra.mrb[8].mxu1 %v943_v42  ;;  %v2051_v61 = vmul.f32 -1.442695, %v459_v49 }
 0x180   :  { %v2419_v59 = vpop.eup %2418  ;;  %2436 = vrcp.f32 %v764_v52  ;;  %v766_v60 = vadd.f32 1.0, %v2417_v55  ;;  %v2052_v63 = vmul.f32 -1.442695, %v461_v53 }
 0x181   :  { %v2421_v62 = vpop.eup %2420  ;;  %2438 = vrcp.f32 %v765_v56  ;;  %v2053_v1 = vmul.f32 -1.442695, %v463_v58 }
 0x182   :  { %v2423_v0 = vpop.eup %2422  ;;  %2440 = vrcp.f32 %v766_v60 }
 0x183   :  { %v2425_v2 = vpop.eup %2424  ;;  %2442 = vpow2.f32 %v2050_v57  ;;  %v466_v3 = vpop.f32.mrb[28].mxu0  ;;  %v945_v4 = vpack.c.bf16 %v2423_v0, %v2419_v59 }
 0x184   :  { %v2427_v5 = vpop.eup %2426  ;;  %2444 = vpow2.f32 %v2051_v61  ;;  %v467_v6 = vadd.f32 %v466_v3, %v3049_v37  ;;  %v468_v7 = vpop.f32.mrb[29].mxu0  ;;  %v946_v8 = vpack.c.bf16 %v2425_v2, %v2421_v62 }
 0x185   :  { %v2429_v9 = vpop.eup %2428  ;;  %v767_v10 = vadd.f32 1.0, %v2427_v5  ;;  %2446 = vpow2.f32 %v2052_v63  ;;  %v469_v11 = vadd.f32 %v468_v7, %v3053_v38  ;;  %v470_v12 = vpop.f32.mrb[30].mxu0 }
 0x186   :  { %v2431_v13 = vpop.eup %2430  ;;  %v768_v14 = vadd.f32 1.0, %v2429_v9  ;;  %2448 = vpow2.f32 %v2053_v1  ;;  %v471_v15 = vadd.f32 %v470_v12, %v3049_v37  ;;  %1237 = vmatprep.mubr.bf16.mxu1 %v946_v8  ;;  %v472_v16 = vpop.f32.mrb[31].mxu0  ;;  %v2054_v19 = vmul.f32 -1.442695, %v467_v6 }
 0x187   :  { %v2433_v17 = vpop.eup %2432  ;;  %2450 = vrcp.f32 %v767_v10  ;;  %v769_v18 = vadd.f32 1.0, %v2431_v13  ;;  %v473_v20 = vadd.f32 %v472_v16, %v3053_v38  ;;  %1238 = vmatmul.mubr.bf16.gmra.mrb[12].mxu1 %v945_v4  ;;  %v2055_v22 = vmul.f32 -1.442695, %v469_v11 }
 0x188   :  { %2452 = vrcp.f32 %v768_v14  ;;  %v770_v21 = vadd.f32 1.0, %v2433_v17  ;;  %v2056_v24 = vmul.f32 -1.442695, %v471_v15 }
 0x189   :  { %v2435_v23 = vpop.eup %2434  ;;  %2454 = vrcp.f32 %v769_v18  ;;  %v2057_v26 = vmul.f32 -1.442695, %v473_v20 }
 0x18a   :  { %v2437_v25 = vpop.eup %2436  ;;  %2456 = vrcp.f32 %v770_v21 }
 0x18b   :  { %v2439_v27 = vpop.eup %2438  ;;  %2458 = vpow2.f32 %v2054_v19  ;;  %v476_v28 = vpop.f32.mrb[32].mxu0 }
 0x18c   :  { %v2441_v29 = vpop.eup %2440  ;;  %2460 = vpow2.f32 %v2055_v22  ;;  %v477_v30 = vadd.f32 %v476_v28, %v3049_v37  ;;  %v478_v31 = vpop.f32.mrb[33].mxu0  ;;  %v947_v32 = vpack.c.bf16 %v2439_v27, %v2435_v23 }
 0x18d   :  { %v2443_v35 = vpop.eup %2442  ;;  %2462 = vpow2.f32 %v2056_v24  ;;  %v479_v39 = vadd.f32 %v478_v31, %v3053_v38  ;;  %v480_v40 = vpop.f32.mrb[34].mxu0  ;;  %v948_v41 = vpack.c.bf16 %v2441_v29, %v2437_v25 }
 0x18e   :  { %v2445_v42 = vpop.eup %2444  ;;  %v771_v43 = vadd.f32 1.0, %v2443_v35  ;;  %2464 = vpow2.f32 %v2057_v26  ;;  %v481_v44 = vadd.f32 %v480_v40, %v3049_v37  ;;  %v482_v45 = vpop.f32.mrb[35].mxu0  ;;  %v2058_v51 = vmul.f32 -1.442695, %v477_v30 }
 0x18f   :  { %v2447_v46 = vpop.eup %2446  ;;  %v772_v47 = vadd.f32 1.0, %v2445_v42  ;;  %1247 = vmatprep.mubr.bf16.mxu1 %v948_v41  ;;  %v483_v48 = vadd.f32 %v482_v45, %v3053_v38  ;;  %v2059_v54 = vmul.f32 -1.442695, %v479_v39 }
 0x190   :  { %v2449_v49 = vpop.eup %2448  ;;  %2466 = vrcp.f32 %v771_v43  ;;  %v773_v50 = vadd.f32 1.0, %v2447_v46  ;;  %1248 = vmatmul.mubr.bf16.gmra.mrb[16].mxu1 %v947_v32  ;;  %v2060_v56 = vmul.f32 -1.442695, %v481_v44 }
 0x191   :  { %v2451_v52 = vpop.eup %2450  ;;  %2468 = vrcp.f32 %v772_v47  ;;  %v774_v53 = vadd.f32 1.0, %v2449_v49  ;;  %v2061_v58 = vmul.f32 -1.442695, %v483_v48 }
 0x192   :  { %v2453_v55 = vpop.eup %2452  ;;  %2470 = vrcp.f32 %v773_v50 }
 0x193   :  { %v2455_v57 = vpop.eup %2454  ;;  %2472 = vrcp.f32 %v774_v53  ;;  %v486_v59 = vpop.f32.mrb[36].mxu0 }
 0x194   :  { %v2457_v60 = vpop.eup %2456  ;;  %2474 = vpow2.f32 %v2058_v51  ;;  %v487_v61 = vadd.f32 %v486_v59, %v3049_v37  ;;  %v488_v62 = vpop.f32.mrb[37].mxu0  ;;  %v949_v63 = vpack.c.bf16 %v2455_v57, %v2451_v52 }
 0x195   :  { %v2459_v0 = vpop.eup %2458  ;;  %2476 = vpow2.f32 %v2059_v54  ;;  %v489_v1 = vadd.f32 %v488_v62, %v3053_v38  ;;  %v490_v2 = vpop.f32.mrb[38].mxu0  ;;  %v950_v3 = vpack.c.bf16 %v2457_v60, %v2453_v55 }
 0x196   :  { %v2461_v4 = vpop.eup %2460  ;;  %v775_v5 = vadd.f32 1.0, %v2459_v0  ;;  %2478 = vpow2.f32 %v2060_v56  ;;  %v491_v6 = vadd.f32 %v490_v2, %v3049_v37  ;;  %v492_v7 = vpop.f32.mrb[39].mxu0  ;;  %v2062_v13 = vmul.f32 -1.442695, %v487_v61 }
 0x197   :  { %v2463_v8 = vpop.eup %2462  ;;  %v776_v9 = vadd.f32 1.0, %v2461_v4  ;;  %2480 = vpow2.f32 %v2061_v58  ;;  %1257 = vmatprep.mubr.bf16.mxu1 %v950_v3  ;;  %v493_v10 = vadd.f32 %v492_v7, %v3053_v38  ;;  %v2063_v15 = vmul.f32 -1.442695, %v489_v1 }
 0x198   :  { %v2465_v11 = vpop.eup %2464  ;;  %2482 = vrcp.f32 %v775_v5  ;;  %v777_v12 = vadd.f32 1.0, %v2463_v8  ;;  %1258 = vmatmul.mubr.bf16.gmra.mrb[20].mxu1 %v949_v63  ;;  %v2064_v17 = vmul.f32 -1.442695, %v491_v6 }
 0x199   :  { %2484 = vrcp.f32 %v776_v9  ;;  %v778_v14 = vadd.f32 1.0, %v2465_v11  ;;  %v2065_v19 = vmul.f32 -1.442695, %v493_v10 }
 0x19a   :  { %v2467_v16 = vpop.eup %2466  ;;  %2486 = vrcp.f32 %v777_v12 }
 0x19b   :  { %v2469_v18 = vpop.eup %2468  ;;  %2488 = vrcp.f32 %v778_v14  ;;  %v496_v20 = vpop.f32.mrb[40].mxu0 }
 0x19c   :  { %v2471_v21 = vpop.eup %2470  ;;  %2490 = vpow2.f32 %v2062_v13  ;;  %v497_v22 = vadd.f32 %v496_v20, %v3049_v37  ;;  %v498_v23 = vpop.f32.mrb[41].mxu0 }
 0x19d   :  { %v2473_v24 = vpop.eup %2472  ;;  %2492 = vpow2.f32 %v2063_v15  ;;  %v499_v25 = vadd.f32 %v498_v23, %v3053_v38  ;;  %v500_v26 = vpop.f32.mrb[42].mxu0  ;;  %v951_v27 = vpack.c.bf16 %v2471_v21, %v2467_v16 }
 0x19e   :  { %v2475_v28 = vpop.eup %2474  ;;  %2494 = vpow2.f32 %v2064_v17  ;;  %v2066_v29 = vmul.f32 -1.442695, %v497_v22  ;;  %v501_v30 = vadd.f32 %v500_v26, %v3049_v37  ;;  %v952_v31 = vpack.c.bf16 %v2473_v24, %v2469_v18  ;;  %v502_v32 = vpop.f32.mrb[43].mxu0 }
 0x19f   :  { %v2477_v35 = vpop.eup %2476  ;;  %v779_v39 = vadd.f32 1.0, %v2475_v28  ;;  %2496 = vpow2.f32 %v2065_v19  ;;  %v503_v40 = vadd.f32 %v502_v32, %v3053_v38  ;;  %v2067_v45 = vmul.f32 -1.442695, %v499_v25 }
 0x1a0   :  { %v2479_v41 = vpop.eup %2478  ;;  %v780_v42 = vadd.f32 1.0, %v2477_v35  ;;  %2498 = vpow2.f32 %v2066_v29  ;;  %1267 = vmatprep.mubr.bf16.mxu1 %v952_v31  ;;  %v2068_v48 = vmul.f32 -1.442695, %v501_v30 }
 0x1a1   :  { %v2481_v43 = vpop.eup %2480  ;;  %2500 = vrcp.f32 %v779_v39  ;;  %v781_v44 = vadd.f32 1.0, %v2479_v41  ;;  %1268 = vmatmul.mubr.bf16.gmra.mrb[24].mxu1 %v951_v27  ;;  %v2069_v50 = vmul.f32 -1.442695, %v503_v40 }
 0x1a2   :  { %v2483_v46 = vpop.eup %2482  ;;  %2502 = vrcp.f32 %v780_v42  ;;  %v782_v47 = vadd.f32 1.0, %v2481_v43 }
 0x1a3   :  { %v2485_v49 = vpop.eup %2484  ;;  %2504 = vrcp.f32 %v781_v44  ;;  %v506_v51 = vpop.f32.mrb[44].mxu0 }
 0x1a4   :  { %v2487_v52 = vpop.eup %2486  ;;  %2506 = vrcp.f32 %v782_v47  ;;  %v507_v53 = vadd.f32 %v506_v51, %v3049_v37  ;;  %v508_v54 = vpop.f32.mrb[45].mxu0 }
 0x1a5   :  { %v2489_v55 = vpop.eup %2488  ;;  %2508 = vpow2.f32 %v2067_v45  ;;  %v510_v56 = vpop.f32.mrb[46].mxu0  ;;  %v953_v57 = vpack.c.bf16 %v2487_v52, %v2483_v46  ;;  %v509_v60 = vadd.f32 %v508_v54, %v3053_v38 }
 0x1a6   :  { %v2491_v58 = vpop.eup %2490  ;;  %2510 = vpow2.f32 %v2068_v48  ;;  %v2070_v59 = vmul.f32 -1.442695, %v507_v53  ;;  %v954_v61 = vpack.c.bf16 %v2489_v55, %v2485_v49  ;;  %v512_v62 = vpop.f32.mrb[47].mxu0  ;;  %v511_v1 = vadd.f32 %v510_v56, %v3049_v37 }
 0x1a7   :  { %v2493_v63 = vpop.eup %2492  ;;  %v783_v0 = vadd.f32 1.0, %v2491_v58  ;;  %2512 = vpow2.f32 %v2069_v50  ;;  %v513_v4 = vadd.f32 %v512_v62, %v3053_v38  ;;  %v2071_v9 = vmul.f32 -1.442695, %v509_v60 }
 0x1a8   :  { %v2495_v2 = vpop.eup %2494  ;;  %v784_v3 = vadd.f32 1.0, %v2493_v63  ;;  %2514 = vpow2.f32 %v2070_v59  ;;  %1277 = vmatprep.mubr.bf16.mxu1 %v954_v61  ;;  %v2072_v12 = vmul.f32 -1.442695, %v511_v1 }
 0x1a9   :  { %v2497_v5 = vpop.eup %2496  ;;  %2516 = vrcp.f32 %v783_v0  ;;  %v785_v6 = vadd.f32 1.0, %v2495_v2  ;;  %1278 = vmatmul.mubr.bf16.gmra.mrb[28].mxu1 %v953_v57  ;;  %v2073_v15 = vmul.f32 -1.442695, %v513_v4 }
 0x1aa   :  { %v2499_v7 = vpop.eup %2498  ;;  %2518 = vrcp.f32 %v784_v3  ;;  %v786_v8 = vadd.f32 1.0, %v2497_v5 }
 0x1ab   :  { %v2501_v10 = vpop.eup %2500  ;;  %2520 = vrcp.f32 %v785_v6  ;;  %v787_v11 = vadd.f32 1.0, %v2499_v7  ;;  %v516_v13 = vpop.f32.mrb[48].mxu0 }
 0x1ac   :  { %v2503_v14 = vpop.eup %2502  ;;  %2522 = vrcp.f32 %v786_v8  ;;  %v517_v16 = vadd.f32 %v516_v13, %v3049_v37  ;;  %v518_v17 = vpop.f32.mrb[49].mxu0 }
 0x1ad   :  { %v2505_v18 = vpop.eup %2504  ;;  %2524 = vrcp.f32 %v787_v11  ;;  %v520_v19 = vpop.f32.mrb[50].mxu0  ;;  %v519_v22 = vadd.f32 %v518_v17, %v3053_v38 }
 0x1ae   :  { %v2507_v20 = vpop.eup %2506  ;;  %2526 = vpow2.f32 %v2071_v9  ;;  %v2074_v21 = vmul.f32 -1.442695, %v517_v16  ;;  %v522_v23 = vpop.f32.mrb[51].mxu0  ;;  %v955_v24 = vpack.c.bf16 %v2505_v18, %v2501_v10  ;;  %v521_v26 = vadd.f32 %v520_v19, %v3049_v37 }
 0x1af   :  { %v2509_v25 = vpop.eup %2508  ;;  %2528 = vpow2.f32 %v2072_v12  ;;  %v956_v27 = vpack.c.bf16 %v2507_v20, %v2503_v14  ;;  %v523_v30 = vadd.f32 %v522_v23, %v3053_v38  ;;  %v2075_v40 = vmul.f32 -1.442695, %v519_v22 }
 0x1b0   :  { %v2511_v28 = vpop.eup %2510  ;;  %v788_v29 = vadd.f32 1.0, %v2509_v25  ;;  %2530 = vpow2.f32 %v2073_v15  ;;  %v2076_v43 = vmul.f32 -1.442695, %v521_v26 }
 0x1b1   :  { %v2513_v31 = vpop.eup %2512  ;;  %v789_v32 = vadd.f32 1.0, %v2511_v28  ;;  %2532 = vpow2.f32 %v2074_v21  ;;  %1287 = vmatprep.mubr.bf16.mxu1 %v956_v27  ;;  %v2077_v46 = vmul.f32 -1.442695, %v523_v30 }
 0x1b2   :  { %v2515_v35 = vpop.eup %2514  ;;  %2534 = vrcp.f32 %v788_v29  ;;  %v790_v39 = vadd.f32 1.0, %v2513_v31  ;;  %1288 = vmatmul.mubr.bf16.gmra.mrb[32].mxu1 %v955_v24 }
 0x1b3   :  { %v2517_v41 = vpop.eup %2516  ;;  %2536 = vrcp.f32 %v789_v32  ;;  %v791_v42 = vadd.f32 1.0, %v2515_v35  ;;  %v526_v44 = vpop.f32.mrb[52].mxu0 }
 0x1b4   :  { %v2519_v45 = vpop.eup %2518  ;;  %2538 = vrcp.f32 %v790_v39  ;;  %v527_v47 = vadd.f32 %v526_v44, %v3049_v37  ;;  %v528_v48 = vpop.f32.mrb[53].mxu0 }
 0x1b5   :  { %v2521_v49 = vpop.eup %2520  ;;  %2540 = vrcp.f32 %v791_v42  ;;  %v529_v50 = vadd.f32 %v528_v48, %v3053_v38  ;;  %v530_v51 = vpop.f32.mrb[54].mxu0 }
 0x1b6   :  { %v2523_v52 = vpop.eup %2522  ;;  %2542 = vpow2.f32 %v2075_v40  ;;  %v2078_v53 = vmul.f32 -1.442695, %v527_v47  ;;  %v532_v54 = vpop.f32.mrb[55].mxu0  ;;  %v957_v55 = vpack.c.bf16 %v2521_v49, %v2517_v41  ;;  %v531_v58 = vadd.f32 %v530_v51, %v3049_v37 }
 0x1b7   :  { %v2525_v56 = vpop.eup %2524  ;;  %2544 = vpow2.f32 %v2076_v43  ;;  %v2079_v57 = vmul.f32 -1.442695, %v529_v50  ;;  %v958_v59 = vpack.c.bf16 %v2523_v52, %v2519_v45  ;;  %v533_v61 = vadd.f32 %v532_v54, %v3053_v38 }
 0x1b8   :  { %v2527_v60 = vpop.eup %2526  ;;  %2546 = vpow2.f32 %v2077_v46  ;;  %v2080_v4 = vmul.f32 -1.442695, %v531_v58 }
 0x1b9   :  { %v2529_v62 = vpop.eup %2528  ;;  %v792_v63 = vadd.f32 1.0, %v2527_v60  ;;  %2548 = vpow2.f32 %v2078_v53  ;;  %1297 = vmatprep.mubr.bf16.mxu1 %v958_v59  ;;  %v2081_v8 = vmul.f32 -1.442695, %v533_v61 }
 0x1ba   :  { %v2531_v0 = vpop.eup %2530  ;;  %v793_v1 = vadd.f32 1.0, %v2529_v62  ;;  %2550 = vpow2.f32 %v2079_v57  ;;  %1298 = vmatmul.mubr.bf16.gmra.mrb[36].mxu1 %v957_v55 }
 0x1bb   :  { %v2533_v2 = vpop.eup %2532  ;;  %2552 = vrcp.f32 %v792_v63  ;;  %v794_v3 = vadd.f32 1.0, %v2531_v0  ;;  %v536_v5 = vpop.f32.mrb[56].mxu0 }
 0x1bc   :  { %v2535_v6 = vpop.eup %2534  ;;  %2554 = vrcp.f32 %v793_v1  ;;  %v795_v7 = vadd.f32 1.0, %v2533_v2  ;;  %v537_v9 = vadd.f32 %v536_v5, %v3049_v37  ;;  %v538_v10 = vpop.f32.mrb[57].mxu0 }
 0x1bd   :  { %v2537_v11 = vpop.eup %2536  ;;  %2556 = vrcp.f32 %v794_v3  ;;  %v539_v12 = vadd.f32 %v538_v10, %v3053_v38  ;;  %v540_v13 = vpop.f32.mrb[58].mxu0 }
 0x1be   :  { %v2539_v14 = vpop.eup %2538  ;;  %2558 = vrcp.f32 %v795_v7  ;;  %v2082_v15 = vmul.f32 -1.442695, %v537_v9  ;;  %v542_v16 = vpop.f32.mrb[59].mxu0  ;;  %v959_v17 = vpack.c.bf16 %v2537_v11, %v2525_v56  ;;  %v541_v22 = vadd.f32 %v540_v13, %v3049_v37 }
 0x1bf   :  { %v2541_v18 = vpop.eup %2540  ;;  %2560 = vpow2.f32 %v2080_v4  ;;  %v2083_v19 = vmul.f32 -1.442695, %v539_v12  ;;  %v960_v20 = vpack.c.bf16 %v2539_v14, %v2535_v6  ;;  %v543_v25 = vadd.f32 %v542_v16, %v3053_v38 }
 0x1c0   :  { %v2543_v21 = vpop.eup %2542  ;;  %2562 = vpow2.f32 %v2081_v8  ;;  %v2084_v35 = vmul.f32 -1.442695, %v541_v22 }
 0x1c1   :  { %v2545_v23 = vpop.eup %2544  ;;  %v796_v24 = vadd.f32 1.0, %v2543_v21  ;;  %2564 = vpow2.f32 %v2082_v15  ;;  %1307 = vmatprep.mubr.bf16.mxu1 %v960_v20  ;;  %v2085_v43 = vmul.f32 -1.442695, %v543_v25 }
 0x1c2   :  { %v2547_v26 = vpop.eup %2546  ;;  %v797_v27 = vadd.f32 1.0, %v2545_v23  ;;  %2566 = vpow2.f32 %v2083_v19  ;;  %1308 = vmatmul.mubr.bf16.gmra.mrb[40].mxu1 %v959_v17 }
 0x1c3   :  { %v2549_v28 = vpop.eup %2548  ;;  %2568 = vrcp.f32 %v796_v24  ;;  %v798_v29 = vadd.f32 1.0, %v2547_v26  ;;  %v546_v30 = vpop.f32.mrb[60].mxu0 }
 0x1c4   :  { %v2551_v31 = vpop.eup %2550  ;;  %2570 = vrcp.f32 %v797_v27  ;;  %v799_v32 = vadd.f32 1.0, %v2549_v28  ;;  %v547_v39 = vadd.f32 %v546_v30, %v3049_v37  ;;  %v548_v40 = vpop.f32.mrb[61].mxu0 }
 0x1c5   :  { %v2553_v41 = vpop.eup %2552  ;;  %2572 = vrcp.f32 %v798_v29  ;;  %v800_v42 = vadd.f32 1.0, %v2551_v31  ;;  %v549_v44 = vadd.f32 %v548_v40, %v3053_v38  ;;  %v550_v45 = vpop.f32.mrb[62].mxu0  ;;  %v1003_v40 = vld [vmem:[%s3213_s4] sm:$0x3]  ;;  %s2967_s4 = smov [#allocation8]  }
 0x1c6   :  { %v2555_v46 = vpop.eup %2554  ;;  %2574 = vrcp.f32 %v799_v32  ;;  %v2086_v47 = vmul.f32 -1.442695, %v547_v39  ;;  %v552_v48 = vpop.f32.mrb[63].mxu0  ;;  %v551_v53 = vadd.f32 %v550_v45, %v3049_v37  ;;  %s1981_s10 = sshll.u32 %s2967_s4, 4  ;;  %s1982_s10 = int_to_ptr.vmem [resolvable:$true] %s1981_s10 }
 0x1c7   :  { %v2557_v49 = vpop.eup %2556  ;;  %2576 = vrcp.f32 %v800_v42  ;;  %v2087_v50 = vmul.f32 -1.442695, %v549_v44  ;;  %v961_v51 = vpack.c.bf16 %v2555_v46, %v2541_v18  ;;  %v553_v56 = vadd.f32 %v552_v48, %v3053_v38  ;;  %s2932_s11 = scalar_lea.vmem %s1982_s10, 4096  ;;  %p2937_p11 = scmp.lt.s32.totalorder %s1982_s10, %s1982_s10 }
 0x1c8   :  { %v2559_v52 = vpop.eup %2558  ;;  %2578 = vpow2.f32 %v2084_v35  ;;  %v962_v54 = vpack.c.bf16 %v2557_v49, %v2553_v41  ;;  %v2088_v62 = vmul.f32 -1.442695, %v551_v53  ;;  %v3124_v41 = vrot.slane %v1003_v40, %v194_v34  ;;  %p2933_p10 = scmp.ne.s32.totalorder %s1982_s10, %s2932_s11  ;;  %p2938_p12 = scmp.lt.s32.totalorder %s2932_s11, %s2932_s11 }
 0x1c9   :  { %v2561_v55 = vpop.eup %2560  ;;  %2580 = vpow2.f32 %v2085_v43  ;;  %v2089_v0 = vmul.f32 -1.442695, %v553_v56  ;;  %v3128_v42 = vrot.slane %v1003_v40, %v198_v36 }
 0x1ca   :  { %v2563_v57 = vpop.eup %2562  ;;  %v801_v58 = vadd.f32 1.0, %v2561_v55  ;;  %2582 = vpow2.f32 %v2086_v47  ;;  %1317 = vmatprep.mubr.bf16.mxu1 %v962_v54  ;;  %p2939_p13 = por %p2938_p12, %p2937_p11 }
 0x1cb   :  { %v2565_v59 = vpop.eup %2564  ;;  %v802_v60 = vadd.f32 1.0, %v2563_v57  ;;  %2584 = vpow2.f32 %v2087_v50  ;;  %1318 = vmatmul.mubr.bf16.gmra.mrb[44].mxu1 %v961_v51 }
 0x1cc   :  { %v2567_v61 = vpop.eup %2566  ;;  %2586 = vrcp.f32 %v801_v58  ;;  %v803_v2 = vadd.f32 1.0, %v2565_v59  ;;  %p2940_p0 = pnand %p2939_p13, %p2933_p10 }
 0x1cd   :  { %v2569_v63 = vpop.eup %2568  ;;  %2588 = vrcp.f32 %v802_v60  ;;  %v804_v38 = vadd.f32 1.0, %v2567_v61 }
 0x1ce   :  { %v2571_v37 = vpop.eup %2570  ;;  %2590 = vpow2.f32 %v2088_v62 }
 0x1cf   :  { %v2573_v1 = vpop.eup %2572  ;;  %v963_v3 = vpack.c.bf16 %v2571_v37, %v2559_v52  ;;  %2592 = vpow2.f32 %v2089_v0 }
 0x1d0   :  { %v2575_v4 = vpop.eup %2574  ;;  %v964_v5 = vpack.c.bf16 %v2573_v1, %v2569_v63  ;;  %2594 = vrcp.f32 %v803_v2 }
 0x1d1   :  { %v2577_v6 = vpop.eup %2576  ;;  %2596 = vrcp.f32 %v804_v38 }
 0x1d2   :  { %v2579_v7 = vpop.eup %2578  ;;  %1327 = vmatprep.mubr.bf16.mxu1 %v964_v5 }
 0x1d3   :  { %v2581_v8 = vpop.eup %2580  ;;  %v805_v9 = vadd.f32 1.0, %v2579_v7  ;;  %1328 = vmatmul.mubr.bf16.gmra.mrb[48].mxu1 %v963_v3 }
 0x1d4   :  { %v2583_v10 = vpop.eup %2582  ;;  %v806_v11 = vadd.f32 1.0, %v2581_v8 }
 0x1d5   :  { %v2585_v12 = vpop.eup %2584  ;;  %2598 = vrcp.f32 %v805_v9  ;;  %v807_v15 = vadd.f32 1.0, %v2583_v10 }
 0x1d6   :  { %v2587_v13 = vpop.eup %2586  ;;  %2600 = vrcp.f32 %v806_v11  ;;  %v808_v17 = vadd.f32 1.0, %v2585_v12 }
 0x1d7   :  { %v2589_v14 = vpop.eup %2588  ;;  %v965_v16 = vpack.c.bf16 %v2587_v13, %v2575_v4  ;;  %2602 = vrcp.f32 %v807_v15 }
 0x1d8   :  { %v966_v18 = vpack.c.bf16 %v2589_v14, %v2577_v6  ;;  %v2591_v19 = vpop.eup %2590  ;;  %2604 = vrcp.f32 %v808_v17 }
 0x1d9   :  { %v2593_v20 = vpop.eup %2592  ;;  %v809_v21 = vadd.f32 1.0, %v2591_v19 }
 0x1da   :  { %1337 = vmatprep.mubr.bf16.mxu1 %v966_v18  ;;  %v810_v22 = vadd.f32 1.0, %v2593_v20  ;;  %v2595_v23 = vpop.eup %2594 }
 0x1db   :  { %1338 = vmatmul.mubr.bf16.gmra.mrb[52].mxu1 %v965_v16  ;;  %2606 = vrcp.f32 %v809_v21  ;;  %v2597_v24 = vpop.eup %2596 }
 0x1dc   :  { %2608 = vrcp.f32 %v810_v22 }
 0x1df   :  { %v2599_v25 = vpop.eup %2598 }
 0x1e0   :  { %v2601_v26 = vpop.eup %2600  ;;  %v967_v27 = vpack.c.bf16 %v2599_v25, %v2595_v23 }
 0x1e1   :  { %v968_v28 = vpack.c.bf16 %v2601_v26, %v2597_v24  ;;  %v2603_v29 = vpop.eup %2602 }
 0x1e2   :  { %v2605_v30 = vpop.eup %2604 }
 0x1e3   :  { %1347 = vmatprep.mubr.bf16.mxu1 %v968_v28 }
 0x1e4   :  { %1348 = vmatmul.mubr.bf16.gmra.mrb[56].mxu1 %v967_v27 }
 0x1e5   :  { %v2607_v31 = vpop.eup %2606 }
 0x1e6   :  { %v2609_v32 = vpop.eup %2608  ;;  %v969_v35 = vpack.c.bf16 %v2607_v31, %v2603_v29 }
 0x1e7   :  { %v970_v39 = vpack.c.bf16 %v2609_v32, %v2605_v30 }
 0x1e9   :  { %1357 = vmatprep.mubr.bf16.mxu1 %v970_v39 }
 0x1ec   :  { %1358 = vmatmul.mubr.bf16.gmra.mrb[60].mxu1 %v969_v35 }
 0x241   :  { %v1209_v43 = vpop.f32.mrb[0].mxu1 }
 0x242   :  { %v1210_v44 = vadd.f32 %v1209_v43, %v3124_v41  ;;  %v1211_v45 = vpop.f32.mrb[1].mxu1 }
 0x243   :  { %v1212_v46 = vadd.f32 %v1211_v45, %v3128_v42  ;;  %v1213_v47 = vpop.f32.mrb[2].mxu1 }
 0x244   :  { %v2122_v48 = vmul.f32 -1.442695, %v1210_v44  ;;  %v1214_v49 = vadd.f32 %v1213_v47, %v3124_v41  ;;  %v1215_v50 = vpop.f32.mrb[3].mxu1 }
 0x245   :  { %v2123_v51 = vmul.f32 -1.442695, %v1212_v46  ;;  %v1216_v52 = vadd.f32 %v1215_v50, %v3128_v42 }
 0x246   :  { %2610 = vpow2.f32 %v2122_v48  ;;  %v2124_v34 = vmul.f32 -1.442695, %v1214_v49 }
 0x247   :  { %2612 = vpow2.f32 %v2123_v51  ;;  %v2125_v33 = vmul.f32 -1.442695, %v1216_v52 }
 0x248   :  { %2614 = vpow2.f32 %v2124_v34 }
 0x249   :  { %2616 = vpow2.f32 %v2125_v33  ;;  %v1219_v36 = vpop.f32.mrb[4].mxu1 }
 0x24a   :  { %v1220_v53 = vadd.f32 %v1219_v36, %v3124_v41  ;;  %v1221_v54 = vpop.f32.mrb[5].mxu1 }
 0x24b   :  { %v1222_v55 = vadd.f32 %v1221_v54, %v3128_v42  ;;  %v1223_v56 = vpop.f32.mrb[6].mxu1 }
 0x24c   :  { %v2126_v57 = vmul.f32 -1.442695, %v1220_v53  ;;  %v1224_v58 = vadd.f32 %v1223_v56, %v3124_v41  ;;  %v1225_v59 = vpop.f32.mrb[7].mxu1 }
 0x24d   :  { %v2127_v60 = vmul.f32 -1.442695, %v1222_v55  ;;  %v1226_v61 = vadd.f32 %v1225_v59, %v3128_v42 }
 0x24e   :  { %2618 = vpow2.f32 %v2126_v57  ;;  %v2128_v62 = vmul.f32 -1.442695, %v1224_v58 }
 0x24f   :  { %2620 = vpow2.f32 %v2127_v60  ;;  %v2129_v63 = vmul.f32 -1.442695, %v1226_v61 }
 0x250   :  { %v2611_v0 = vpop.eup %2610  ;;  %2622 = vpow2.f32 %v2128_v62 }
 0x251   :  { %v2613_v37 = vpop.eup %2612  ;;  %v1560_v1 = vadd.f32 1.0, %v2611_v0  ;;  %2624 = vpow2.f32 %v2129_v63 }
 0x252   :  { %v2615_v2 = vpop.eup %2614  ;;  %v1561_v3 = vadd.f32 1.0, %v2613_v37  ;;  %v1229_v4 = vpop.f32.mrb[8].mxu1 }
 0x253   :  { %v2617_v38 = vpop.eup %2616  ;;  %2626 = vrcp.f32 %v1560_v1  ;;  %v1562_v5 = vadd.f32 1.0, %v2615_v2  ;;  %v1230_v6 = vadd.f32 %v1229_v4, %v3124_v41  ;;  %v1231_v7 = vpop.f32.mrb[9].mxu1 }
 0x254   :  { %2628 = vrcp.f32 %v1561_v3  ;;  %v1563_v8 = vadd.f32 1.0, %v2617_v38  ;;  %v1232_v9 = vadd.f32 %v1231_v7, %v3128_v42  ;;  %v1233_v10 = vpop.f32.mrb[10].mxu1 }
 0x255   :  { %2630 = vrcp.f32 %v1562_v5  ;;  %v2130_v11 = vmul.f32 -1.442695, %v1230_v6  ;;  %v1234_v12 = vadd.f32 %v1233_v10, %v3124_v41  ;;  %v1235_v13 = vpop.f32.mrb[11].mxu1 }
 0x256   :  { %2632 = vrcp.f32 %v1563_v8  ;;  %v2131_v14 = vmul.f32 -1.442695, %v1232_v9  ;;  %v1236_v15 = vadd.f32 %v1235_v13, %v3128_v42 }
 0x257   :  { %2634 = vpow2.f32 %v2130_v11  ;;  %v2132_v16 = vmul.f32 -1.442695, %v1234_v12 }
 0x258   :  { %v2619_v17 = vpop.eup %2618  ;;  %2636 = vpow2.f32 %v2131_v14  ;;  %v2133_v18 = vmul.f32 -1.442695, %v1236_v15 }
 0x259   :  { %v2621_v19 = vpop.eup %2620  ;;  %v1564_v20 = vadd.f32 1.0, %v2619_v17  ;;  %2638 = vpow2.f32 %v2132_v16 }
 0x25a   :  { %v2623_v21 = vpop.eup %2622  ;;  %v1565_v22 = vadd.f32 1.0, %v2621_v19  ;;  %2640 = vpow2.f32 %v2133_v18  ;;  %v1239_v23 = vpop.f32.mrb[12].mxu1 }
 0x25b   :  { %v2625_v24 = vpop.eup %2624  ;;  %2642 = vrcp.f32 %v1564_v20  ;;  %v1566_v25 = vadd.f32 1.0, %v2623_v21  ;;  %v1240_v26 = vadd.f32 %v1239_v23, %v3124_v41  ;;  %v1241_v27 = vpop.f32.mrb[13].mxu1 }
 0x25c   :  { %2644 = vrcp.f32 %v1565_v22  ;;  %v1567_v28 = vadd.f32 1.0, %v2625_v24  ;;  %v1242_v29 = vadd.f32 %v1241_v27, %v3128_v42  ;;  %v1243_v30 = vpop.f32.mrb[14].mxu1 }
 0x25d   :  { %v2627_v31 = vpop.eup %2626  ;;  %2646 = vrcp.f32 %v1566_v25  ;;  %v2134_v32 = vmul.f32 -1.442695, %v1240_v26  ;;  %v1244_v35 = vadd.f32 %v1243_v30, %v3124_v41  ;;  %v1245_v39 = vpop.f32.mrb[15].mxu1 }
 0x25e   :  { %v2629_v40 = vpop.eup %2628  ;;  %2648 = vrcp.f32 %v1567_v28  ;;  %v2135_v43 = vmul.f32 -1.442695, %v1242_v29  ;;  %v1246_v44 = vadd.f32 %v1245_v39, %v3128_v42 }
 0x25f   :  { %v2631_v45 = vpop.eup %2630  ;;  %v2218_v46 = vpack.c.bf16 %v2629_v40, %v2627_v31  ;;  %2650 = vpow2.f32 %v2134_v32  ;;  %v2136_v47 = vmul.f32 -1.442695, %v1244_v35 }
 0x260   :  { %v2633_v48 = vpop.eup %2632  ;;  %2652 = vpow2.f32 %v2135_v43  ;;  %v2137_v49 = vmul.f32 -1.442695, %v1246_v44 }
 0x261   :  { %v2635_v50 = vpop.eup %2634  ;;  %1944 = vst [vmem:[#allocation8] sm:$0xff] %v2218_v46  ;;  %v2219_v51 = vpack.c.bf16 %v2633_v48, %v2631_v45  ;;  %2654 = vpow2.f32 %v2136_v47 }
 0x262   :  { %v2637_v52 = vpop.eup %2636  ;;  %v1568_v34 = vadd.f32 1.0, %v2635_v50  ;;  %2656 = vpow2.f32 %v2137_v49 }
 0x263   :  { %v2639_v33 = vpop.eup %2638  ;;  %1945 = vst [vmem:[#allocation8 + $0x8] sm:$0xff] %v2219_v51  ;;  %v1569_v36 = vadd.f32 1.0, %v2637_v52  ;;  %v1249_v53 = vpop.f32.mrb[16].mxu1 }
 0x264   :  { %v2641_v54 = vpop.eup %2640  ;;  %2658 = vrcp.f32 %v1568_v34  ;;  %v1570_v55 = vadd.f32 1.0, %v2639_v33  ;;  %v1250_v56 = vadd.f32 %v1249_v53, %v3124_v41  ;;  %v1251_v57 = vpop.f32.mrb[17].mxu1 }
 0x265   :  { %v2643_v58 = vpop.eup %2642  ;;  %2660 = vrcp.f32 %v1569_v36  ;;  %v1571_v59 = vadd.f32 1.0, %v2641_v54  ;;  %v1252_v60 = vadd.f32 %v1251_v57, %v3128_v42  ;;  %v1253_v61 = vpop.f32.mrb[18].mxu1 }
 0x266   :  { %v2645_v62 = vpop.eup %2644  ;;  %2662 = vrcp.f32 %v1570_v55  ;;  %v2138_v63 = vmul.f32 -1.442695, %v1250_v56  ;;  %v1254_v0 = vadd.f32 %v1253_v61, %v3124_v41  ;;  %v1255_v37 = vpop.f32.mrb[19].mxu1 }
 0x267   :  { %v2647_v1 = vpop.eup %2646  ;;  %v2220_v2 = vpack.c.bf16 %v2645_v62, %v2643_v58  ;;  %2664 = vrcp.f32 %v1571_v59  ;;  %v2139_v3 = vmul.f32 -1.442695, %v1252_v60  ;;  %v1256_v4 = vadd.f32 %v1255_v37, %v3128_v42 }
 0x268   :  { %v2649_v38 = vpop.eup %2648  ;;  %2666 = vpow2.f32 %v2138_v63  ;;  %v2140_v5 = vmul.f32 -1.442695, %v1254_v0 }
 0x269   :  { %v2651_v6 = vpop.eup %2650  ;;  %1946 = vst [vmem:[#allocation8 + $0x10] sm:$0xff] %v2220_v2  ;;  %v2221_v7 = vpack.c.bf16 %v2649_v38, %v2647_v1  ;;  %2668 = vpow2.f32 %v2139_v3  ;;  %v2141_v8 = vmul.f32 -1.442695, %v1256_v4 }
 0x26a   :  { %v2653_v9 = vpop.eup %2652  ;;  %v1572_v10 = vadd.f32 1.0, %v2651_v6  ;;  %2670 = vpow2.f32 %v2140_v5 }
 0x26b   :  { %v2655_v11 = vpop.eup %2654  ;;  %1947 = vst [vmem:[#allocation8 + $0x18] sm:$0xff] %v2221_v7  ;;  %v1573_v12 = vadd.f32 1.0, %v2653_v9  ;;  %2672 = vpow2.f32 %v2141_v8  ;;  %v1259_v13 = vpop.f32.mrb[20].mxu1 }
 0x26c   :  { %v2657_v14 = vpop.eup %2656  ;;  %2674 = vrcp.f32 %v1572_v10  ;;  %v1574_v15 = vadd.f32 1.0, %v2655_v11  ;;  %v1260_v16 = vadd.f32 %v1259_v13, %v3124_v41  ;;  %v1261_v17 = vpop.f32.mrb[21].mxu1 }
 0x26d   :  { %2676 = vrcp.f32 %v1573_v12  ;;  %v1575_v18 = vadd.f32 1.0, %v2657_v14  ;;  %v1262_v19 = vadd.f32 %v1261_v17, %v3128_v42  ;;  %v1263_v20 = vpop.f32.mrb[22].mxu1 }
 0x26e   :  { %v2659_v21 = vpop.eup %2658  ;;  %2678 = vrcp.f32 %v1574_v15  ;;  %v2142_v22 = vmul.f32 -1.442695, %v1260_v16  ;;  %v1264_v23 = vadd.f32 %v1263_v20, %v3124_v41  ;;  %v1265_v24 = vpop.f32.mrb[23].mxu1 }
 0x26f   :  { %v2661_v25 = vpop.eup %2660  ;;  %2680 = vrcp.f32 %v1575_v18  ;;  %v2143_v26 = vmul.f32 -1.442695, %v1262_v19  ;;  %v1266_v27 = vadd.f32 %v1265_v24, %v3128_v42 }
 0x270   :  { %v2663_v28 = vpop.eup %2662  ;;  %v2222_v29 = vpack.c.bf16 %v2661_v25, %v2659_v21  ;;  %2682 = vpow2.f32 %v2142_v22  ;;  %v2144_v30 = vmul.f32 -1.442695, %v1264_v23 }
 0x271   :  { %v2665_v31 = vpop.eup %2664  ;;  %2684 = vpow2.f32 %v2143_v26  ;;  %v2145_v32 = vmul.f32 -1.442695, %v1266_v27 }
 0x272   :  { %v2667_v35 = vpop.eup %2666  ;;  %1948 = vst [vmem:[#allocation8 + $0x20] sm:$0xff] %v2222_v29  ;;  %v2223_v39 = vpack.c.bf16 %v2665_v31, %v2663_v28  ;;  %2686 = vpow2.f32 %v2144_v30 }
 0x273   :  { %v2669_v40 = vpop.eup %2668  ;;  %v1576_v43 = vadd.f32 1.0, %v2667_v35  ;;  %2688 = vpow2.f32 %v2145_v32 }
 0x274   :  { %v2671_v44 = vpop.eup %2670  ;;  %1949 = vst [vmem:[#allocation8 + $0x28] sm:$0xff] %v2223_v39  ;;  %v1577_v45 = vadd.f32 1.0, %v2669_v40  ;;  %v1269_v46 = vpop.f32.mrb[24].mxu1 }
 0x275   :  { %v2673_v47 = vpop.eup %2672  ;;  %2690 = vrcp.f32 %v1576_v43  ;;  %v1578_v48 = vadd.f32 1.0, %v2671_v44  ;;  %v1270_v49 = vadd.f32 %v1269_v46, %v3124_v41  ;;  %v1271_v50 = vpop.f32.mrb[25].mxu1 }
 0x276   :  { %v2675_v51 = vpop.eup %2674  ;;  %2692 = vrcp.f32 %v1577_v45  ;;  %v1579_v52 = vadd.f32 1.0, %v2673_v47  ;;  %v1272_v34 = vadd.f32 %v1271_v50, %v3128_v42  ;;  %v1273_v33 = vpop.f32.mrb[26].mxu1 }
 0x277   :  { %v2677_v36 = vpop.eup %2676  ;;  %2694 = vrcp.f32 %v1578_v48  ;;  %v2146_v53 = vmul.f32 -1.442695, %v1270_v49  ;;  %v1274_v54 = vadd.f32 %v1273_v33, %v3124_v41  ;;  %v1275_v55 = vpop.f32.mrb[27].mxu1 }
 0x278   :  { %v2679_v56 = vpop.eup %2678  ;;  %v2224_v57 = vpack.c.bf16 %v2677_v36, %v2675_v51  ;;  %2696 = vrcp.f32 %v1579_v52  ;;  %v2147_v58 = vmul.f32 -1.442695, %v1272_v34  ;;  %v1276_v59 = vadd.f32 %v1275_v55, %v3128_v42 }
 0x279   :  { %v2681_v60 = vpop.eup %2680  ;;  %2698 = vpow2.f32 %v2146_v53  ;;  %v2148_v61 = vmul.f32 -1.442695, %v1274_v54 }
 0x27a   :  { %v2683_v62 = vpop.eup %2682  ;;  %1950 = vst [vmem:[#allocation8 + $0x30] sm:$0xff] %v2224_v57  ;;  %v2225_v63 = vpack.c.bf16 %v2681_v60, %v2679_v56  ;;  %2700 = vpow2.f32 %v2147_v58  ;;  %v2149_v0 = vmul.f32 -1.442695, %v1276_v59 }
 0x27b   :  { %v2685_v37 = vpop.eup %2684  ;;  %v1580_v1 = vadd.f32 1.0, %v2683_v62  ;;  %2702 = vpow2.f32 %v2148_v61 }
 0x27c   :  { %v2687_v2 = vpop.eup %2686  ;;  %1951 = vst [vmem:[#allocation8 + $0x38] sm:$0xff] %v2225_v63  ;;  %v1581_v3 = vadd.f32 1.0, %v2685_v37  ;;  %2704 = vpow2.f32 %v2149_v0  ;;  %v1279_v4 = vpop.f32.mrb[28].mxu1 }
 0x27d   :  { %v2689_v38 = vpop.eup %2688  ;;  %2706 = vrcp.f32 %v1580_v1  ;;  %v1582_v5 = vadd.f32 1.0, %v2687_v2  ;;  %v1280_v6 = vadd.f32 %v1279_v4, %v3124_v41  ;;  %v1281_v7 = vpop.f32.mrb[29].mxu1 }
 0x27e   :  { %2708 = vrcp.f32 %v1581_v3  ;;  %v1583_v8 = vadd.f32 1.0, %v2689_v38  ;;  %v1282_v9 = vadd.f32 %v1281_v7, %v3128_v42  ;;  %v1283_v10 = vpop.f32.mrb[30].mxu1 }
 0x27f   :  { %v2691_v11 = vpop.eup %2690  ;;  %2710 = vrcp.f32 %v1582_v5  ;;  %v2150_v12 = vmul.f32 -1.442695, %v1280_v6  ;;  %v1284_v13 = vadd.f32 %v1283_v10, %v3124_v41  ;;  %v1285_v14 = vpop.f32.mrb[31].mxu1 }
 0x280   :  { %v2693_v15 = vpop.eup %2692  ;;  %2712 = vrcp.f32 %v1583_v8  ;;  %v2151_v16 = vmul.f32 -1.442695, %v1282_v9  ;;  %v1286_v17 = vadd.f32 %v1285_v14, %v3128_v42 }
 0x281   :  { %v2695_v18 = vpop.eup %2694  ;;  %v2226_v19 = vpack.c.bf16 %v2693_v15, %v2691_v11  ;;  %2714 = vpow2.f32 %v2150_v12  ;;  %v2152_v20 = vmul.f32 -1.442695, %v1284_v13 }
 0x282   :  { %v2697_v21 = vpop.eup %2696  ;;  %2716 = vpow2.f32 %v2151_v16  ;;  %v2153_v22 = vmul.f32 -1.442695, %v1286_v17 }
 0x283   :  { %v2699_v23 = vpop.eup %2698  ;;  %1952 = vst [vmem:[#allocation8 + $0x40] sm:$0xff] %v2226_v19  ;;  %v2227_v24 = vpack.c.bf16 %v2697_v21, %v2695_v18  ;;  %2718 = vpow2.f32 %v2152_v20 }
 0x284   :  { %v2701_v25 = vpop.eup %2700  ;;  %v1584_v26 = vadd.f32 1.0, %v2699_v23  ;;  %2720 = vpow2.f32 %v2153_v22 }
 0x285   :  { %v2703_v27 = vpop.eup %2702  ;;  %1953 = vst [vmem:[#allocation8 + $0x48] sm:$0xff] %v2227_v24  ;;  %v1585_v28 = vadd.f32 1.0, %v2701_v25  ;;  %v1289_v29 = vpop.f32.mrb[32].mxu1 }
 0x286   :  { %v2705_v30 = vpop.eup %2704  ;;  %2722 = vrcp.f32 %v1584_v26  ;;  %v1586_v31 = vadd.f32 1.0, %v2703_v27  ;;  %v1290_v32 = vadd.f32 %v1289_v29, %v3124_v41  ;;  %v1291_v35 = vpop.f32.mrb[33].mxu1 }
 0x287   :  { %v2707_v39 = vpop.eup %2706  ;;  %2724 = vrcp.f32 %v1585_v28  ;;  %v1587_v40 = vadd.f32 1.0, %v2705_v30  ;;  %v1292_v43 = vadd.f32 %v1291_v35, %v3128_v42  ;;  %v1293_v44 = vpop.f32.mrb[34].mxu1 }
 0x288   :  { %v2709_v45 = vpop.eup %2708  ;;  %2726 = vrcp.f32 %v1586_v31  ;;  %v2154_v46 = vmul.f32 -1.442695, %v1290_v32  ;;  %v1294_v47 = vadd.f32 %v1293_v44, %v3124_v41  ;;  %v1295_v48 = vpop.f32.mrb[35].mxu1 }
 0x289   :  { %v2711_v49 = vpop.eup %2710  ;;  %v2228_v50 = vpack.c.bf16 %v2709_v45, %v2707_v39  ;;  %2728 = vrcp.f32 %v1587_v40  ;;  %v2155_v51 = vmul.f32 -1.442695, %v1292_v43  ;;  %v1296_v52 = vadd.f32 %v1295_v48, %v3128_v42 }
 0x28a   :  { %v2713_v34 = vpop.eup %2712  ;;  %2730 = vpow2.f32 %v2154_v46  ;;  %v2156_v33 = vmul.f32 -1.442695, %v1294_v47 }
 0x28b   :  { %v2715_v36 = vpop.eup %2714  ;;  %1954 = vst [vmem:[#allocation8 + $0x50] sm:$0xff] %v2228_v50  ;;  %v2229_v53 = vpack.c.bf16 %v2713_v34, %v2711_v49  ;;  %2732 = vpow2.f32 %v2155_v51  ;;  %v2157_v54 = vmul.f32 -1.442695, %v1296_v52 }
 0x28c   :  { %v2717_v55 = vpop.eup %2716  ;;  %v1588_v56 = vadd.f32 1.0, %v2715_v36  ;;  %2734 = vpow2.f32 %v2156_v33 }
 0x28d   :  { %v2719_v57 = vpop.eup %2718  ;;  %1955 = vst [vmem:[#allocation8 + $0x58] sm:$0xff] %v2229_v53  ;;  %v1589_v58 = vadd.f32 1.0, %v2717_v55  ;;  %2736 = vpow2.f32 %v2157_v54  ;;  %v1299_v59 = vpop.f32.mrb[36].mxu1 }
 0x28e   :  { %v2721_v60 = vpop.eup %2720  ;;  %2738 = vrcp.f32 %v1588_v56  ;;  %v1590_v61 = vadd.f32 1.0, %v2719_v57  ;;  %v1300_v62 = vadd.f32 %v1299_v59, %v3124_v41  ;;  %v1301_v63 = vpop.f32.mrb[37].mxu1 }
 0x28f   :  { %2740 = vrcp.f32 %v1589_v58  ;;  %v1591_v0 = vadd.f32 1.0, %v2721_v60  ;;  %v1302_v37 = vadd.f32 %v1301_v63, %v3128_v42  ;;  %v1303_v1 = vpop.f32.mrb[38].mxu1 }
 0x290   :  { %v2723_v2 = vpop.eup %2722  ;;  %2742 = vrcp.f32 %v1590_v61  ;;  %v2158_v3 = vmul.f32 -1.442695, %v1300_v62  ;;  %v1304_v4 = vadd.f32 %v1303_v1, %v3124_v41  ;;  %v1305_v38 = vpop.f32.mrb[39].mxu1 }
 0x291   :  { %v2725_v5 = vpop.eup %2724  ;;  %2744 = vrcp.f32 %v1591_v0  ;;  %v2159_v6 = vmul.f32 -1.442695, %v1302_v37  ;;  %v1306_v7 = vadd.f32 %v1305_v38, %v3128_v42 }
 0x292   :  { %v2727_v8 = vpop.eup %2726  ;;  %v2230_v9 = vpack.c.bf16 %v2725_v5, %v2723_v2  ;;  %2746 = vpow2.f32 %v2158_v3  ;;  %v2160_v10 = vmul.f32 -1.442695, %v1304_v4 }
 0x293   :  { %v2729_v11 = vpop.eup %2728  ;;  %2748 = vpow2.f32 %v2159_v6  ;;  %v2161_v12 = vmul.f32 -1.442695, %v1306_v7 }
 0x294   :  { %v2731_v13 = vpop.eup %2730  ;;  %1956 = vst [vmem:[#allocation8 + $0x60] sm:$0xff] %v2230_v9  ;;  %v2231_v14 = vpack.c.bf16 %v2729_v11, %v2727_v8  ;;  %2750 = vpow2.f32 %v2160_v10 }
 0x295   :  { %v2733_v15 = vpop.eup %2732  ;;  %v1592_v16 = vadd.f32 1.0, %v2731_v13  ;;  %2752 = vpow2.f32 %v2161_v12  ;;  %v1309_v17 = vpop.f32.mrb[40].mxu1 }
 0x296   :  { %v2735_v18 = vpop.eup %2734  ;;  %1957 = vst [vmem:[#allocation8 + $0x68] sm:$0xff] %v2231_v14  ;;  %v1593_v19 = vadd.f32 1.0, %v2733_v15  ;;  %v1310_v20 = vadd.f32 %v1309_v17, %v3124_v41  ;;  %v1311_v21 = vpop.f32.mrb[41].mxu1 }
 0x297   :  { %v2737_v22 = vpop.eup %2736  ;;  %2754 = vrcp.f32 %v1592_v16  ;;  %v1594_v23 = vadd.f32 1.0, %v2735_v18  ;;  %v1312_v24 = vadd.f32 %v1311_v21, %v3128_v42  ;;  %v1313_v25 = vpop.f32.mrb[42].mxu1 }
 0x298   :  { %v2739_v26 = vpop.eup %2738  ;;  %2756 = vrcp.f32 %v1593_v19  ;;  %v1595_v27 = vadd.f32 1.0, %v2737_v22  ;;  %v2162_v28 = vmul.f32 -1.442695, %v1310_v20  ;;  %v1314_v29 = vadd.f32 %v1313_v25, %v3124_v41  ;;  %v1315_v30 = vpop.f32.mrb[43].mxu1 }
 0x299   :  { %v2741_v31 = vpop.eup %2740  ;;  %2758 = vrcp.f32 %v1594_v23  ;;  %v2163_v32 = vmul.f32 -1.442695, %v1312_v24  ;;  %v1316_v35 = vadd.f32 %v1315_v30, %v3128_v42 }
 0x29a   :  { %v2743_v39 = vpop.eup %2742  ;;  %v2232_v40 = vpack.c.bf16 %v2741_v31, %v2739_v26  ;;  %2760 = vrcp.f32 %v1595_v27  ;;  %v2164_v43 = vmul.f32 -1.442695, %v1314_v29 }
 0x29b   :  { %v2745_v44 = vpop.eup %2744  ;;  %2762 = vpow2.f32 %v2162_v28  ;;  %v2165_v45 = vmul.f32 -1.442695, %v1316_v35 }
 0x29c   :  { %v2747_v46 = vpop.eup %2746  ;;  %1958 = vst [vmem:[#allocation8 + $0x70] sm:$0xff] %v2232_v40  ;;  %v2233_v47 = vpack.c.bf16 %v2745_v44, %v2743_v39  ;;  %2764 = vpow2.f32 %v2163_v32 }
 0x29d   :  { %v2749_v48 = vpop.eup %2748  ;;  %v1596_v49 = vadd.f32 1.0, %v2747_v46  ;;  %2766 = vpow2.f32 %v2164_v43 }
 0x29e   :  { %v2751_v50 = vpop.eup %2750  ;;  %1959 = vst [vmem:[#allocation8 + $0x78] sm:$0xff] %v2233_v47  ;;  %v1597_v51 = vadd.f32 1.0, %v2749_v48  ;;  %2768 = vpow2.f32 %v2165_v45  ;;  %v1319_v52 = vpop.f32.mrb[44].mxu1 }
 0x29f   :  { %v2753_v34 = vpop.eup %2752  ;;  %2770 = vrcp.f32 %v1596_v49  ;;  %v1598_v33 = vadd.f32 1.0, %v2751_v50  ;;  %v1320_v36 = vadd.f32 %v1319_v52, %v3124_v41  ;;  %v1321_v53 = vpop.f32.mrb[45].mxu1 }
 0x2a0   :  { %2772 = vrcp.f32 %v1597_v51  ;;  %v1599_v54 = vadd.f32 1.0, %v2753_v34  ;;  %v1322_v55 = vadd.f32 %v1321_v53, %v3128_v42  ;;  %v1323_v56 = vpop.f32.mrb[46].mxu1 }
 0x2a1   :  { %v2755_v57 = vpop.eup %2754  ;;  %2774 = vrcp.f32 %v1598_v33  ;;  %v2166_v58 = vmul.f32 -1.442695, %v1320_v36  ;;  %v1324_v59 = vadd.f32 %v1323_v56, %v3124_v41  ;;  %v1325_v60 = vpop.f32.mrb[47].mxu1 }
 0x2a2   :  { %v2757_v61 = vpop.eup %2756  ;;  %2776 = vrcp.f32 %v1599_v54  ;;  %v2167_v62 = vmul.f32 -1.442695, %v1322_v55  ;;  %v1326_v63 = vadd.f32 %v1325_v60, %v3128_v42 }
 0x2a3   :  { %v2759_v0 = vpop.eup %2758  ;;  %v2234_v37 = vpack.c.bf16 %v2757_v61, %v2755_v57  ;;  %2778 = vpow2.f32 %v2166_v58  ;;  %v2168_v1 = vmul.f32 -1.442695, %v1324_v59 }
 0x2a4   :  { %v2761_v2 = vpop.eup %2760  ;;  %2780 = vpow2.f32 %v2167_v62  ;;  %v2169_v3 = vmul.f32 -1.442695, %v1326_v63 }
 0x2a5   :  { %v2763_v4 = vpop.eup %2762  ;;  %1960 = vst [vmem:[#allocation8 + $0x80] sm:$0xff] %v2234_v37  ;;  %v2235_v38 = vpack.c.bf16 %v2761_v2, %v2759_v0  ;;  %2782 = vpow2.f32 %v2168_v1 }
 0x2a6   :  { %v2765_v5 = vpop.eup %2764  ;;  %v1600_v6 = vadd.f32 1.0, %v2763_v4  ;;  %2784 = vpow2.f32 %v2169_v3  ;;  %v1329_v7 = vpop.f32.mrb[48].mxu1 }
 0x2a7   :  { %v2767_v8 = vpop.eup %2766  ;;  %1961 = vst [vmem:[#allocation8 + $0x88] sm:$0xff] %v2235_v38  ;;  %v1601_v9 = vadd.f32 1.0, %v2765_v5  ;;  %v1330_v10 = vadd.f32 %v1329_v7, %v3124_v41  ;;  %v1331_v11 = vpop.f32.mrb[49].mxu1 }
 0x2a8   :  { %v2769_v12 = vpop.eup %2768  ;;  %2786 = vrcp.f32 %v1600_v6  ;;  %v1602_v13 = vadd.f32 1.0, %v2767_v8  ;;  %v1332_v14 = vadd.f32 %v1331_v11, %v3128_v42  ;;  %v1333_v15 = vpop.f32.mrb[50].mxu1 }
 0x2a9   :  { %v2771_v16 = vpop.eup %2770  ;;  %2788 = vrcp.f32 %v1601_v9  ;;  %v1603_v17 = vadd.f32 1.0, %v2769_v12  ;;  %v2170_v18 = vmul.f32 -1.442695, %v1330_v10  ;;  %v1334_v19 = vadd.f32 %v1333_v15, %v3124_v41  ;;  %v1335_v20 = vpop.f32.mrb[51].mxu1 }
 0x2aa   :  { %v2773_v21 = vpop.eup %2772  ;;  %2790 = vrcp.f32 %v1602_v13  ;;  %v2171_v22 = vmul.f32 -1.442695, %v1332_v14  ;;  %v1336_v23 = vadd.f32 %v1335_v20, %v3128_v42 }
 0x2ab   :  { %v2775_v24 = vpop.eup %2774  ;;  %v2236_v25 = vpack.c.bf16 %v2773_v21, %v2771_v16  ;;  %2792 = vrcp.f32 %v1603_v17  ;;  %v2172_v26 = vmul.f32 -1.442695, %v1334_v19 }
 0x2ac   :  { %v2777_v27 = vpop.eup %2776  ;;  %2794 = vpow2.f32 %v2170_v18  ;;  %v2173_v28 = vmul.f32 -1.442695, %v1336_v23 }
 0x2ad   :  { %v2779_v29 = vpop.eup %2778  ;;  %1962 = vst [vmem:[#allocation8 + $0x90] sm:$0xff] %v2236_v25  ;;  %v2237_v30 = vpack.c.bf16 %v2777_v27, %v2775_v24  ;;  %2796 = vpow2.f32 %v2171_v22 }
 0x2ae   :  { %v2781_v31 = vpop.eup %2780  ;;  %v1604_v32 = vadd.f32 1.0, %v2779_v29  ;;  %2798 = vpow2.f32 %v2172_v26  ;;  %v1339_v35 = vpop.f32.mrb[52].mxu1 }
 0x2af   :  { %v2783_v39 = vpop.eup %2782  ;;  %1963 = vst [vmem:[#allocation8 + $0x98] sm:$0xff] %v2237_v30  ;;  %v1605_v40 = vadd.f32 1.0, %v2781_v31  ;;  %2800 = vpow2.f32 %v2173_v28  ;;  %v1340_v43 = vadd.f32 %v1339_v35, %v3124_v41  ;;  %v1341_v44 = vpop.f32.mrb[53].mxu1 }
 0x2b0   :  { %v2785_v45 = vpop.eup %2784  ;;  %2802 = vrcp.f32 %v1604_v32  ;;  %v1606_v46 = vadd.f32 1.0, %v2783_v39  ;;  %v1342_v47 = vadd.f32 %v1341_v44, %v3128_v42  ;;  %v1343_v48 = vpop.f32.mrb[54].mxu1 }
 0x2b1   :  { %2804 = vrcp.f32 %v1605_v40  ;;  %v1607_v49 = vadd.f32 1.0, %v2785_v45  ;;  %v2174_v50 = vmul.f32 -1.442695, %v1340_v43  ;;  %v1344_v51 = vadd.f32 %v1343_v48, %v3124_v41  ;;  %v1345_v52 = vpop.f32.mrb[55].mxu1 }
 0x2b2   :  { %v2787_v34 = vpop.eup %2786  ;;  %2806 = vrcp.f32 %v1606_v46  ;;  %v2175_v33 = vmul.f32 -1.442695, %v1342_v47  ;;  %v1346_v36 = vadd.f32 %v1345_v52, %v3128_v42 }
 0x2b3   :  { %v2789_v53 = vpop.eup %2788  ;;  %2808 = vrcp.f32 %v1607_v49  ;;  %v2176_v54 = vmul.f32 -1.442695, %v1344_v51 }
 0x2b4   :  { %v2791_v55 = vpop.eup %2790  ;;  %v2238_v56 = vpack.c.bf16 %v2789_v53, %v2787_v34  ;;  %2810 = vpow2.f32 %v2174_v50  ;;  %v2177_v57 = vmul.f32 -1.442695, %v1346_v36 }
 0x2b5   :  { %v2793_v58 = vpop.eup %2792  ;;  %2812 = vpow2.f32 %v2175_v33 }
 0x2b6   :  { %v2795_v59 = vpop.eup %2794  ;;  %1964 = vst [vmem:[#allocation8 + $0xa0] sm:$0xff] %v2238_v56  ;;  %v2239_v60 = vpack.c.bf16 %v2793_v58, %v2791_v55  ;;  %2814 = vpow2.f32 %v2176_v54 }
 0x2b7   :  { %v2797_v61 = vpop.eup %2796  ;;  %v1608_v62 = vadd.f32 1.0, %v2795_v59  ;;  %2816 = vpow2.f32 %v2177_v57  ;;  %v1349_v63 = vpop.f32.mrb[56].mxu1 }
 0x2b8   :  { %v2799_v0 = vpop.eup %2798  ;;  %1965 = vst [vmem:[#allocation8 + $0xa8] sm:$0xff] %v2239_v60  ;;  %v1609_v37 = vadd.f32 1.0, %v2797_v61  ;;  %v1350_v1 = vadd.f32 %v1349_v63, %v3124_v41  ;;  %v1351_v2 = vpop.f32.mrb[57].mxu1 }
 0x2b9   :  { %v2801_v3 = vpop.eup %2800  ;;  %2818 = vrcp.f32 %v1608_v62  ;;  %v1610_v4 = vadd.f32 1.0, %v2799_v0  ;;  %v1352_v38 = vadd.f32 %v1351_v2, %v3128_v42  ;;  %v1353_v5 = vpop.f32.mrb[58].mxu1 }
 0x2ba   :  { %v2803_v6 = vpop.eup %2802  ;;  %2820 = vrcp.f32 %v1609_v37  ;;  %v1611_v7 = vadd.f32 1.0, %v2801_v3  ;;  %v2178_v8 = vmul.f32 -1.442695, %v1350_v1  ;;  %v1354_v9 = vadd.f32 %v1353_v5, %v3124_v41  ;;  %v1355_v10 = vpop.f32.mrb[59].mxu1 }
 0x2bb   :  { %v2805_v11 = vpop.eup %2804  ;;  %2822 = vrcp.f32 %v1610_v4  ;;  %v2179_v12 = vmul.f32 -1.442695, %v1352_v38  ;;  %v1356_v13 = vadd.f32 %v1355_v10, %v3128_v42 }
 0x2bc   :  { %v2807_v14 = vpop.eup %2806  ;;  %v2240_v15 = vpack.c.bf16 %v2805_v11, %v2803_v6  ;;  %2824 = vrcp.f32 %v1611_v7  ;;  %v2180_v16 = vmul.f32 -1.442695, %v1354_v9 }
 0x2bd   :  { %v2809_v17 = vpop.eup %2808  ;;  %2826 = vpow2.f32 %v2178_v8  ;;  %v2181_v18 = vmul.f32 -1.442695, %v1356_v13 }
 0x2be   :  { %v2811_v19 = vpop.eup %2810  ;;  %1966 = vst [vmem:[#allocation8 + $0xb0] sm:$0xff] %v2240_v15  ;;  %v2241_v20 = vpack.c.bf16 %v2809_v17, %v2807_v14  ;;  %2828 = vpow2.f32 %v2179_v12 }
 0x2bf   :  { %v2813_v21 = vpop.eup %2812  ;;  %v1612_v22 = vadd.f32 1.0, %v2811_v19  ;;  %2830 = vpow2.f32 %v2180_v16  ;;  %v1359_v23 = vpop.f32.mrb[60].mxu1 }
 0x2c0   :  { %v2815_v24 = vpop.eup %2814  ;;  %1967 = vst [vmem:[#allocation8 + $0xb8] sm:$0xff] %v2241_v20  ;;  %v1613_v25 = vadd.f32 1.0, %v2813_v21  ;;  %2832 = vpow2.f32 %v2181_v18  ;;  %v1360_v26 = vadd.f32 %v1359_v23, %v3124_v41  ;;  %v1361_v27 = vpop.f32.mrb[61].mxu1 }
 0x2c1   :  { %v2817_v28 = vpop.eup %2816  ;;  %2834 = vrcp.f32 %v1612_v22  ;;  %v1614_v29 = vadd.f32 1.0, %v2815_v24  ;;  %v1362_v30 = vadd.f32 %v1361_v27, %v3128_v42  ;;  %v1363_v31 = vpop.f32.mrb[62].mxu1 }
 0x2c2   :  { %2836 = vrcp.f32 %v1613_v25  ;;  %v1615_v32 = vadd.f32 1.0, %v2817_v28  ;;  %v2182_v35 = vmul.f32 -1.442695, %v1360_v26  ;;  %v1364_v39 = vadd.f32 %v1363_v31, %v3124_v41  ;;  %v1365_v40 = vpop.f32.mrb[63].mxu1 }
 0x2c3   :  { %v2819_v43 = vpop.eup %2818  ;;  %2838 = vrcp.f32 %v1614_v29  ;;  %v2183_v44 = vmul.f32 -1.442695, %v1362_v30  ;;  %v1366_v45 = vadd.f32 %v1365_v40, %v3128_v42 }
 0x2c4   :  { %v2821_v46 = vpop.eup %2820  ;;  %2840 = vrcp.f32 %v1615_v32  ;;  %v2184_v47 = vmul.f32 -1.442695, %v1364_v39 }
 0x2c5   :  { %v2823_v48 = vpop.eup %2822  ;;  %v2242_v49 = vpack.c.bf16 %v2821_v46, %v2819_v43  ;;  %2842 = vpow2.f32 %v2182_v35  ;;  %v2185_v50 = vmul.f32 -1.442695, %v1366_v45 }
 0x2c6   :  { %v2825_v51 = vpop.eup %2824  ;;  %2844 = vpow2.f32 %v2183_v44 }
 0x2c7   :  { %v2827_v52 = vpop.eup %2826  ;;  %1968 = vst [vmem:[#allocation8 + $0xc0] sm:$0xff] %v2242_v49  ;;  %v2243_v34 = vpack.c.bf16 %v2825_v51, %v2823_v48  ;;  %2846 = vpow2.f32 %v2184_v47 }
 0x2c8   :  { %v2829_v41 = vpop.eup %2828  ;;  %v1616_v33 = vadd.f32 1.0, %v2827_v52  ;;  %2848 = vpow2.f32 %v2185_v50 }
 0x2c9   :  { %v2831_v36 = vpop.eup %2830  ;;  %1969 = vst [vmem:[#allocation8 + $0xc8] sm:$0xff] %v2243_v34  ;;  %v1617_v53 = vadd.f32 1.0, %v2829_v41 }
 0x2ca   :  { %v2833_v42 = vpop.eup %2832  ;;  %2850 = vrcp.f32 %v1616_v33  ;;  %v1618_v54 = vadd.f32 1.0, %v2831_v36 }
 0x2cb   :  { %v2835_v55 = vpop.eup %2834  ;;  %2852 = vrcp.f32 %v1617_v53  ;;  %v1619_v56 = vadd.f32 1.0, %v2833_v42 }
 0x2cc   :  { %v2837_v57 = vpop.eup %2836  ;;  %2854 = vrcp.f32 %v1618_v54 }
 0x2cd   :  { %v2839_v58 = vpop.eup %2838  ;;  %v2244_v59 = vpack.c.bf16 %v2837_v57, %v2835_v55  ;;  %2856 = vrcp.f32 %v1619_v56 }
 0x2ce   :  { %v2841_v60 = vpop.eup %2840 }
 0x2cf   :  { %v2843_v61 = vpop.eup %2842  ;;  %1970 = vst [vmem:[#allocation8 + $0xd0] sm:$0xff] %v2244_v59  ;;  %v2245_v62 = vpack.c.bf16 %v2841_v60, %v2839_v58 }
 0x2d0   :  { %v2845_v63 = vpop.eup %2844  ;;  %v1620_v0 = vadd.f32 1.0, %v2843_v61 }
 0x2d1   :  { %v2847_v37 = vpop.eup %2846  ;;  %1971 = vst [vmem:[#allocation8 + $0xd8] sm:$0xff] %v2245_v62  ;;  %v1621_v1 = vadd.f32 1.0, %v2845_v63 }
 0x2d2   :  { %v2849_v2 = vpop.eup %2848  ;;  %2858 = vrcp.f32 %v1620_v0  ;;  %v1622_v3 = vadd.f32 1.0, %v2847_v37 }
 0x2d3   :  { %2860 = vrcp.f32 %v1621_v1  ;;  %v1623_v4 = vadd.f32 1.0, %v2849_v2 }
 0x2d4   :  { %v2851_v38 = vpop.eup %2850  ;;  %2862 = vrcp.f32 %v1622_v3 }
 0x2d5   :  { %v2853_v5 = vpop.eup %2852  ;;  %2864 = vrcp.f32 %v1623_v4 }
 0x2d6   :  { %v2855_v6 = vpop.eup %2854  ;;  %v2246_v7 = vpack.c.bf16 %v2853_v5, %v2851_v38 }
 0x2d7   :  { %v2857_v8 = vpop.eup %2856 }
 0x2d8   :  { %1972 = vst [vmem:[#allocation8 + $0xe0] sm:$0xff] %v2246_v7  ;;  %v2247_v9 = vpack.c.bf16 %v2857_v8, %v2855_v6 }
 0x2da   :  { %1973 = vst [vmem:[#allocation8 + $0xe8] sm:$0xff] %v2247_v9 }
 0x2dc   :  { %v2859_v10 = vpop.eup %2858 }
 0x2dd   :  { %v2861_v11 = vpop.eup %2860 }
 0x2de   :  { %v2863_v12 = vpop.eup %2862  ;;  %v2248_v13 = vpack.c.bf16 %v2861_v11, %v2859_v10 }
 0x2df   :  { %v2865_v14 = vpop.eup %2864 }
 0x2e0   :  { %1974 = vst [vmem:[#allocation8 + $0xf0] sm:$0xff] %v2248_v13  ;;  %v2249_v15 = vpack.c.bf16 %v2865_v14, %v2863_v12 }
 0x2e2   :  { %1975 = vst [vmem:[#allocation8 + $0xf8] sm:$0xff] %v2249_v15 }
 0x2e3   :  { %2943 = shalt.err (!%p2940_p0)
}
 0x2e4   :  { %s2944_s14 = scalar_lea.hbm %s3214_s5, 4096 }
 0x2e5   :  { %p2945_p1 = scmp.ne.s32.totalorder %s3214_s5, %s2944_s14  ;;  %p2948_p2 = scmp.lt.u32.totalorder %s2944_s14, %s3214_s5 }
 0x2e7   :  { %p2950_p3 = pnand %p2948_p2, %p2945_p1 }
 0x2e9   :  { %2953 = shalt.err (!%p2950_p3)
}
 0x2ea   :  { %1987 = dma.vmem_to_hbm [thread:$0]  %s1982_s10, 4096, %s3214_s5, [#allocation4], %s2961_s28, %s2961_s28, %s2962_s29  }
 0x2eb   :  { %2958 = dma.done.wait [#allocation4], 4096  }
 0x2ec   :  { %2959 = vsyncadd [#allocation4], 4294963200 }
 0x2ed   :  { %1991 = vsyncpa [#allocation3], 1 }
 0x2ee   :  { %1992 = vsyncpa [#allocation6], 1 }
 0x2ef   :  { %1993 = vsyncpa [#allocation4], 1 }

</bundles_post_ra>
